<compile_context>
chip_gen: v6e
topology: v6e:2x2x1
jax: 0.10.0
libtpu: 0.0.40
codegen_flags: <defaults>
</compile_context>

<pallas_src>
import math
import functools

import jax
import jax.numpy as jnp
from jax.experimental import pallas as pl
from jax.experimental.pallas import tpu as pltpu

LN_EPS = 1e-6  # torchvision ViT uses LayerNorm(eps=1e-6)


def _layernorm(v, w, b):
    # v: (S, D) f32; w, b: (1, D) f32. Biased variance (PyTorch LayerNorm).
    mu = jnp.mean(v, axis=-1, keepdims=True)
    var = jnp.mean(jnp.square(v - mu), axis=-1, keepdims=True)
    return (v - mu) * jax.lax.rsqrt(var + LN_EPS) * w + b


# --------------------------- kernel A: LN1 + packed K/V projection ---------------------------
def kv_proj_kernel(x_ref, ln1_w_ref, ln1_b_ref, kv_wT_ref, kv_b_ref, kv_ref):
    x = x_ref[0]                                                # (Tq, D) f32
    h = _layernorm(x, ln1_w_ref[...], ln1_b_ref[...])           # f32
    # bf16 operands, f32 accumulation on the MXU; single lane-dense (Tq, 2D) store.
    kv = jnp.dot(h.astype(jnp.bfloat16), kv_wT_ref[...],
                 preferred_element_type=jnp.float32) + kv_b_ref[...]     # (Tq, 2D) f32
    kv_ref[0] = kv.astype(kv_ref.dtype)


# ------------- kernel B: Q proj + attention + out_proj + residual + LN2 + MLP -------------
def attn_mlp_kernel(x_ref, kv_ref, mask_ref,
                    ln1_w_ref, ln1_b_ref, wqT_ref, qb_ref,
                    out_wT_ref, out_b_ref,
                    ln2_w_ref, ln2_b_ref,
                    w1T_ref, b1_ref, w2T_ref, b2_ref,
                    o_ref, *, num_heads):
    x = x_ref[0]                                                # (Tq, D) f32 (residual)
    Tq, D = x.shape
    H = num_heads
    Dh = D // H

    # Recompute LN1 on the tile and project Q in-kernel (no Q HBM round trip).
    h = _layernorm(x, ln1_w_ref[...], ln1_b_ref[...])
    q = jnp.dot(h.astype(jnp.bfloat16), wqT_ref[...],
                preferred_element_type=jnp.float32) + qb_ref[...]        # (Tq, D), scale folded

    kv = kv_ref[0]                                              # (S, 2D) bf16, full sequence
    S = kv.shape[0]
    k3 = kv[:, :D].reshape(S, H, Dh)                            # bf16
    v3 = kv[:, D:].reshape(S, H, Dh)                            # bf16
    q3 = q.astype(jnp.bfloat16).reshape(Tq, H, Dh)

    # Head-batched attention; padded key columns masked out before the softmax.
    s = jnp.einsum("qhd,khd->hqk", q3, k3,
                   preferred_element_type=jnp.float32)          # (H, Tq, S) f32
    s = s + mask_ref[...]                                       # (1, S) additive key mask
    m = jnp.max(s, axis=-1, keepdims=True)
    e = jnp.exp(s - m)                                          # un-normalized weights
    denom = jnp.sum(e, axis=-1, keepdims=True)                  # (H, Tq, 1)
    ctx = jnp.einsum("hqk,khd->hqd", e.astype(jnp.bfloat16), v3,
                     preferred_element_type=jnp.float32)        # (H, Tq, Dh) f32
    # Deferred softmax normalization (H*Tq*Dh multiplies, EUP reciprocal).
    ctx = ctx * pl.reciprocal(denom, approx=True)

    attn = jnp.swapaxes(ctx, 0, 1).reshape(Tq, D)               # merge heads
    attn = jnp.dot(attn.astype(jnp.bfloat16), out_wT_ref[...],
                   preferred_element_type=jnp.float32) + out_b_ref[...]

    # dropout == identity in eval mode
    x1 = attn + x                                               # residual 1 (f32)

    y = _layernorm(x1, ln2_w_ref[...], ln2_b_ref[...])
    y = jnp.dot(y.astype(jnp.bfloat16), w1T_ref[...],
                preferred_element_type=jnp.float32) + b1_ref[...]        # (Tq, Dm)
    y = jax.nn.gelu(y, approximate=False)                       # exact erf GELU (f32)
    y = jnp.dot(y.astype(jnp.bfloat16), w2T_ref[...],
                preferred_element_type=jnp.float32) + b2_ref[...]        # (Tq, D)

    o_ref[0] = (x1 + y).astype(o_ref.dtype)                     # residual 2


# --------------------------------- wrapper ---------------------------------
def _prep_params(p, num_heads, D):
    """Split/pre-transpose weights, fold 1/sqrt(Dh) into Q projection, cast to bf16."""
    Dh = D // num_heads
    scale = 1.0 / math.sqrt(Dh)
    bf16 = jnp.bfloat16

    in_w = jnp.asarray(p["in_w"], jnp.float32)                  # (3D, D) rows = [q; k; v]
    in_b = jnp.asarray(p["in_b"], jnp.float32).reshape(1, 3 * D)
    wq = in_w[:D] * scale                                       # fold q scale
    qb = in_b[:, :D] * scale
    wkv = in_w[D:]                                              # (2D, D)
    kvb = in_b[:, D:]                                           # (1, 2D)

    return dict(
        ln1_w=jnp.asarray(p["ln1_w"], jnp.float32).reshape(1, D),
        ln1_b=jnp.asarray(p["ln1_b"], jnp.float32).reshape(1, D),
        wqT=wq.T.astype(bf16),                                  # (D, D)
        q_b=qb,                                                 # (1, D) f32
        kv_wT=wkv.T.astype(bf16),                               # (D, 2D)
        kv_b=kvb,                                               # (1, 2D) f32
        out_wT=jnp.asarray(p["out_w"], jnp.float32).T.astype(bf16),     # (D, D)
        out_b=jnp.asarray(p["out_b"], jnp.float32).reshape(1, D),
        ln2_w=jnp.asarray(p["ln2_w"], jnp.float32).reshape(1, D),
        ln2_b=jnp.asarray(p["ln2_b"], jnp.float32).reshape(1, D),
        w1T=jnp.asarray(p["w1"], jnp.float32).T.astype(bf16),           # (D, Dm)
        b1=jnp.asarray(p["b1"], jnp.float32).reshape(1, -1),
        w2T=jnp.asarray(p["w2"], jnp.float32).T.astype(bf16),           # (Dm, D)
        b2=jnp.asarray(p["b2"], jnp.float32).reshape(1, D),
    )


def _vmem_limit_bytes():
    """Generation-aware VMEM limit: ~80% of capacity (≈51 MiB on v7x, ≈102 MiB on v5e/v6e)."""
    default = 64 * 1024 * 1024
    try:
        cap = int(pltpu.get_tpu_info().vmem_capacity_bytes)
    except Exception:
        return default
    if cap <= 0:
        return default
    return max(32 * 1024 * 1024, min(int(cap * 0.8), 112 * 1024 * 1024))


def _const_spec(arr, single_buffered):
    """BlockSpec for a grid-constant (weight/bias/mask) input."""
    idx = lambda b, qi, _n=arr.ndim: (0,) * _n
    if single_buffered:
        # Constant index map -> one VMEM buffer is enough; halves resident weight VMEM.
        return pl.BlockSpec(arr.shape, idx, pipeline_mode=pl.Buffered(1))
    return pl.BlockSpec(arr.shape, idx)


def _encoder_block_impl(x, params, num_heads, q_tile, single_buffer_weights):
    B, S, D = x.shape
    assert D % num_heads == 0
    p = _prep_params(params, num_heads, D)

    # Pad the sequence to a lane-dense multiple of 128 (review item #1).
    S_pad = ((S + 127) // 128) * 128
    x_p = jnp.pad(x, ((0, 0), (0, S_pad - S), (0, 0))) if S_pad != S else x

    if q_tile is None:
        q_tile = 256 if S_pad % 256 == 0 else 128   # larger M per step on 256-wide MXUs
    assert S_pad % q_tile == 0
    n_q = S_pad // q_tile

    # Additive key mask: 0 for real keys, -1e30 for padded key columns.
    key_mask = jnp.where(jnp.arange(S_pad) < S, 0.0, -1e30).astype(jnp.float32)
    key_mask = key_mask.reshape(1, S_pad)

    wspec = functools.partial(_const_spec, single_buffered=single_buffer_weights)
    cp = pltpu.CompilerParams(
        dimension_semantics=("parallel", "parallel"),
        vmem_limit_bytes=_vmem_limit_bytes(),
    )

    # ---- kernel A: LN1 + packed K/V projection, tiled over (batch, seq-tile) ----
    kv = pl.pallas_call(
        kv_proj_kernel,
        out_shape=jax.ShapeDtypeStruct((B, S_pad, 2 * D), jnp.bfloat16),
        grid=(B, n_q),
        in_specs=[pl.BlockSpec((1, q_tile, D), lambda b, qi: (b, qi, 0)),
                  wspec(p["ln1_w"]), wspec(p["ln1_b"]),
                  wspec(p["kv_wT"]), wspec(p["kv_b"])],
        out_specs=pl.BlockSpec((1, q_tile, 2 * D), lambda b, qi: (b, qi, 0)),
        compiler_params=cp,
    )(x_p, p["ln1_w"], p["ln1_b"], p["kv_wT"], p["kv_b"])

    # ---- kernel B: Q proj + attention (full K/V per q-tile) + out_proj + LN2 + MLP ----
    kernel = functools.partial(attn_mlp_kernel, num_heads=num_heads)
    out = pl.pallas_call(
        kernel,
        out_shape=jax.ShapeDtypeStruct((B, S_pad, D), x.dtype),
        grid=(B, n_q),
        in_specs=[
            pl.BlockSpec((1, q_tile, D), lambda b, qi: (b, qi, 0)),       # x tile (residual + Q)
            pl.BlockSpec((1, S_pad, 2 * D), lambda b, qi: (b, 0, 0)),     # packed K/V, full seq
            wspec(key_mask),
            wspec(p["ln1_w"]), wspec(p["ln1_b"]),
            wspec(p["wqT"]), wspec(p["q_b"]),
            wspec(p["out_wT"]), wspec(p["out_b"]),
            wspec(p["ln2_w"]), wspec(p["ln2_b"]),
            wspec(p["w1T"]), wspec(p["b1"]),
            wspec(p["w2T"]), wspec(p["b2"]),
        ],
        out_specs=pl.BlockSpec((1, q_tile, D), lambda b, qi: (b, qi, 0)),
        compiler_params=cp,
    )(x_p, kv, key_mask,
      p["ln1_w"], p["ln1_b"], p["wqT"], p["q_b"],
      p["out_wT"], p["out_b"], p["ln2_w"], p["ln2_b"],
      p["w1T"], p["b1"], p["w2T"], p["b2"])

    return out[:, :S, :] if S_pad != S else out


def encoder_block(x, params, num_heads, *, q_tile=None):
    try:
        return _encoder_block_impl(x, params, num_heads, q_tile, single_buffer_weights=True)
    except Exception:
        # pipeline_mode=pl.Buffered(1) is a pure VMEM-footprint optimization; fall back to
        # default (double-buffered) weight specs on jax versions that reject it.
        return _encoder_block_impl(x, params, num_heads, q_tile, single_buffer_weights=False)


# ------------------------- pure-JAX f32 reference -------------------------
def ref_encoder_block(x, p, num_heads):
    def ln(v, w, b):
        mu = v.mean(-1, keepdims=True)
        var = ((v - mu) ** 2).mean(-1, keepdims=True)
        return (v - mu) / jnp.sqrt(var + LN_EPS) * w + b

    B, S, D = x.shape
    Dh = D // num_heads
    h = ln(x, p["ln1_w"], p["ln1_b"])
    qkv = h @ p["in_w"].T + p["in_b"]
    q, k, v = jnp.split(qkv, 3, axis=-1)
    q = q.reshape(B, S, num_heads, Dh).transpose(0, 2, 1, 3)
    k = k.reshape(B, S, num_heads, Dh).transpose(0, 2, 1, 3)
    v = v.reshape(B, S, num_heads, Dh).transpose(0, 2, 1, 3)
    s = jnp.einsum("bhqd,bhkd->bhqk", q, k) / math.sqrt(Dh)
    a = jnp.einsum("bhqk,bhkd->bhqd", jax.nn.softmax(s, -1), v)
    a = a.transpose(0, 2, 1, 3).reshape(B, S, D)
    a = a @ p["out_w"].T + p["out_b"]
    x1 = a + x
    y = ln(x1, p["ln2_w"], p["ln2_b"])
    y = jax.nn.gelu(y @ p["w1"].T + p["b1"], approximate=False)
    y = y @ p["w2"].T + p["b2"]
    return x1 + y


if __name__ == "__main__":
    B, S, D, H = 2, 8, 128, 4       # batch, seq, hidden, heads (seq gets padded to 128)
    Dm = 4 * D                      # MLP hidden dim (torchvision ViT ratio = 4)

    key = jax.random.PRNGKey(0)
    keys = jax.random.split(key, 10)

    def rnd(k, shape, scale=0.05):
        return (scale * jax.random.normal(k, shape)).astype(jnp.float32)

    params = dict(
        ln1_w=jnp.ones((1, D), jnp.float32),
        ln1_b=jnp.zeros((1, D), jnp.float32),
        in_w=rnd(keys[0], (3 * D, D)),        # MHA in_proj_weight (PyTorch layout)
        in_b=rnd(keys[1], (1, 3 * D)),        # MHA in_proj_bias
        out_w=rnd(keys[2], (D, D)),           # MHA out_proj.weight
        out_b=rnd(keys[3], (1, D)),           # MHA out_proj.bias
        ln2_w=jnp.ones((1, D), jnp.float32),
        ln2_b=jnp.zeros((1, D), jnp.float32),
        w1=rnd(keys[4], (Dm, D)),             # MLP Linear(D -> 4D)
        b1=rnd(keys[5], (1, Dm)),
        w2=rnd(keys[6], (D, Dm)),             # MLP Linear(4D -> D)
        b2=rnd(keys[7], (1, D)),
    )

    x = jax.random.normal(keys[8], (B, S, D), jnp.float32)

    out = encoder_block(x, params, num_heads=H)
    out = jax.block_until_ready(out)

    ref = ref_encoder_block(x, params, num_heads=H)
    assert out.shape == (B, S, D)
    # bf16 MXU operands + approx reciprocal -> loosened tolerance vs. the f32 reference.
    assert jnp.allclose(out, ref, atol=2e-2, rtol=2e-2), "mismatch vs JAX reference"

    print("KERNEL_OK")
</pallas_src>

<mosaic_0001>
module attributes {stable_mosaic.version = 11 : i64} {
  func.func @kv_proj_kernel(%arg0: i32, %arg1: i32, %arg2: memref<1x128x128xf32, #tpu.memory_space<vmem>>, %arg3: memref<1x128xf32, #tpu.memory_space<vmem>>, %arg4: memref<1x128xf32, #tpu.memory_space<vmem>>, %arg5: memref<128x256xbf16, #tpu.memory_space<vmem>>, %arg6: memref<1x256xf32, #tpu.memory_space<vmem>>, %arg7: memref<1x128x256xbf16, #tpu.memory_space<vmem>>) attributes {dimension_semantics = [#tpu.dimension_semantics<parallel>, #tpu.dimension_semantics<parallel>], iteration_bounds = array<i64: 2, 1>, scalar_prefetch = 0 : i64, scratch_operands = 0 : i64, tpu.core_type = #tpu.core_type<tc>, window_params = [{transform_indices = @transform_0, window_bounds = array<i64: 1, 128, 128>}, {pipeline_mode = #tpu.pipeline_mode<synchronous>, transform_indices = @transform_1, window_bounds = array<i64: 1, 128>}, {pipeline_mode = #tpu.pipeline_mode<synchronous>, transform_indices = @transform_2, window_bounds = array<i64: 1, 128>}, {pipeline_mode = #tpu.pipeline_mode<synchronous>, transform_indices = @transform_3, window_bounds = array<i64: 128, 256>}, {pipeline_mode = #tpu.pipeline_mode<synchronous>, transform_indices = @transform_4, window_bounds = array<i64: 1, 256>}, {transform_indices = @transform_5, window_bounds = array<i64: 1, 128, 256>}]} {
    %c0 = arith.constant 0 : index
    %c0_0 = arith.constant 0 : index
    %c0_1 = arith.constant 0 : index
    %0 = vector.load %arg2[%c0, %c0_0, %c0_1] : memref<1x128x128xf32, #tpu.memory_space<vmem>>, vector<1x128x128xf32>
    %1 = vector.shape_cast %0 : vector<1x128x128xf32> to vector<128x128xf32>
    %c0_2 = arith.constant 0 : index
    %c0_3 = arith.constant 0 : index
    %2 = vector.load %arg3[%c0_2, %c0_3] : memref<1x128xf32, #tpu.memory_space<vmem>>, vector<1x128xf32>
    %c0_4 = arith.constant 0 : index
    %c0_5 = arith.constant 0 : index
    %3 = vector.load %arg4[%c0_4, %c0_5] : memref<1x128xf32, #tpu.memory_space<vmem>>, vector<1x128xf32>
    %cst = arith.constant dense<0.000000e+00> : vector<128xf32>
    %4 = vector.multi_reduction <add>, %1, %cst [1] : vector<128x128xf32> to vector<128xf32>
    %5 = vector.shape_cast %4 : vector<128xf32> to vector<128x1xf32>
    %cst_6 = arith.constant 1.280000e+02 : f32
    %6 = vector.broadcast %cst_6 : f32 to vector<128x1xf32>
    %7 = arith.divf %5, %6 : vector<128x1xf32>
    %8 = vector.broadcast %7 : vector<128x1xf32> to vector<128x128xf32>
    %9 = arith.subf %1, %8 : vector<128x128xf32>
    %10 = arith.mulf %9, %9 : vector<128x128xf32>
    %cst_7 = arith.constant dense<0.000000e+00> : vector<128xf32>
    %11 = vector.multi_reduction <add>, %10, %cst_7 [1] : vector<128x128xf32> to vector<128xf32>
    %12 = vector.shape_cast %11 : vector<128xf32> to vector<128x1xf32>
    %cst_8 = arith.constant 1.280000e+02 : f32
    %13 = vector.broadcast %cst_8 : f32 to vector<128x1xf32>
    %14 = arith.divf %12, %13 : vector<128x1xf32>
    %15 = vector.broadcast %7 : vector<128x1xf32> to vector<128x128xf32>
    %16 = arith.subf %1, %15 : vector<128x128xf32>
    %cst_9 = arith.constant 9.99999997E-7 : f32
    %17 = vector.broadcast %cst_9 : f32 to vector<128x1xf32>
    %18 = arith.addf %14, %17 : vector<128x1xf32>
    %19 = math.rsqrt %18 : vector<128x1xf32>
    %20 = vector.broadcast %19 : vector<128x1xf32> to vector<128x128xf32>
    %21 = arith.mulf %16, %20 : vector<128x128xf32>
    %22 = vector.broadcast %2 : vector<1x128xf32> to vector<128x128xf32>
    %23 = arith.mulf %21, %22 : vector<128x128xf32>
    %24 = vector.broadcast %3 : vector<1x128xf32> to vector<128x128xf32>
    %25 = arith.addf %23, %24 : vector<128x128xf32>
    %26 = arith.truncf %25 : vector<128x128xf32> to vector<128x128xbf16>
    %c0_10 = arith.constant 0 : index
    %c0_11 = arith.constant 0 : index
    %27 = vector.load %arg5[%c0_10, %c0_11] : memref<128x256xbf16, #tpu.memory_space<vmem>>, vector<128x256xbf16>
    %cst_12 = arith.constant dense<0.000000e+00> : vector<128x256xf32>
    %28 = tpu.matmul %26, %27, %cst_12 {dimension_numbers = #tpu.dot_dimension_numbers<[1], [0], [0], [1], [0, 0, 1, 1], [], []>} : vector<128x128xbf16>, vector<128x256xbf16>, vector<128x256xf32> -> vector<128x256xf32>
    %c0_13 = arith.constant 0 : index
    %c0_14 = arith.constant 0 : index
    %29 = vector.load %arg6[%c0_13, %c0_14] : memref<1x256xf32, #tpu.memory_space<vmem>>, vector<1x256xf32>
    %30 = vector.broadcast %29 : vector<1x256xf32> to vector<128x256xf32>
    %31 = arith.addf %28, %30 : vector<128x256xf32>
    %32 = arith.truncf %31 : vector<128x256xf32> to vector<128x256xbf16>
    %c0_15 = arith.constant 0 : index
    %c0_16 = arith.constant 0 : index
    %c0_17 = arith.constant 0 : index
    %33 = vector.load %arg7[%c0_15, %c0_16, %c0_17] : memref<1x128x256xbf16, #tpu.memory_space<vmem>>, vector<1x128x256xbf16>
    %34 = vector.shape_cast %33 : vector<1x128x256xbf16> to vector<128x256xbf16>
    %35 = vector.shape_cast %32 : vector<128x256xbf16> to vector<1x128x256xbf16>
    tpu.vector_store %arg7[%c0_15, %c0_16, %c0_17], %35 {strides = array<i32>} : memref<1x128x256xbf16, #tpu.memory_space<vmem>>, vector<1x128x256xbf16>,
    return
  }
  func.func @transform_0(%arg0: i32, %arg1: i32) -> (i32, i32, i32) {
    %c0_i32 = arith.constant 0 : i32
    %c0_i32_0 = arith.constant 0 : i32
    return %arg0, %arg1, %c0_i32 : i32, i32, i32
  }
  func.func @transform_1(%arg0: i32, %arg1: i32) -> (i32, i32) {
    %c0_i32 = arith.constant 0 : i32
    %c0_i32_0 = arith.constant 0 : i32
    %c0_i32_1 = arith.constant 0 : i32
    return %c0_i32, %c0_i32_0 : i32, i32
  }
  func.func @transform_2(%arg0: i32, %arg1: i32) -> (i32, i32) {
    %c0_i32 = arith.constant 0 : i32
    %c0_i32_0 = arith.constant 0 : i32
    %c0_i32_1 = arith.constant 0 : i32
    return %c0_i32, %c0_i32_0 : i32, i32
  }
  func.func @transform_3(%arg0: i32, %arg1: i32) -> (i32, i32) {
    %c0_i32 = arith.constant 0 : i32
    %c0_i32_0 = arith.constant 0 : i32
    %c0_i32_1 = arith.constant 0 : i32
    return %c0_i32, %c0_i32_0 : i32, i32
  }
  func.func @transform_4(%arg0: i32, %arg1: i32) -> (i32, i32) {
    %c0_i32 = arith.constant 0 : i32
    %c0_i32_0 = arith.constant 0 : i32
    %c0_i32_1 = arith.constant 0 : i32
    return %c0_i32, %c0_i32_0 : i32, i32
  }
  func.func @transform_5(%arg0: i32, %arg1: i32) -> (i32, i32, i32) {
    %c0_i32 = arith.constant 0 : i32
    %c0_i32_0 = arith.constant 0 : i32
    return %arg0, %arg1, %c0_i32 : i32, i32, i32
  }
}

module attributes {stable_mosaic.version = 11 : i64} {
  func.func @kv_proj_kernel(%arg0: i32, %arg1: i32, %arg2: memref<1x128x128xf32, #tpu.memory_space<vmem>>, %arg3: memref<1x128xf32, #tpu.memory_space<vmem>>, %arg4: memref<1x128xf32, #tpu.memory_space<vmem>>, %arg5: memref<128x256xbf16, #tpu.memory_space<vmem>>, %arg6: memref<1x256xf32, #tpu.memory_space<vmem>>, %arg7: memref<1x128x256xbf16, #tpu.memory_space<vmem>>) attributes {dimension_semantics = [#tpu.dimension_semantics<parallel>, #tpu.dimension_semantics<parallel>], iteration_bounds = array<i64: 2, 1>, scalar_prefetch = 0 : i64, scratch_operands = 0 : i64, tpu.core_type = #tpu.core_type<tc>, window_params = [{transform_indices = @transform_0, window_bounds = array<i64: 1, 128, 128>}, {pipeline_mode = #tpu.pipeline_mode<synchronous>, transform_indices = @transform_1, window_bounds = array<i64: 1, 128>}, {pipeline_mode = #tpu.pipeline_mode<synchronous>, transform_indices = @transform_2, window_bounds = array<i64: 1, 128>}, {pipeline_mode = #tpu.pipeline_mode<synchronous>, transform_indices = @transform_3, window_bounds = array<i64: 128, 256>}, {pipeline_mode = #tpu.pipeline_mode<synchronous>, transform_indices = @transform_4, window_bounds = array<i64: 1, 256>}, {transform_indices = @transform_5, window_bounds = array<i64: 1, 128, 256>}]} {
    %c0 = arith.constant 0 : index
    %c0_0 = arith.constant 0 : index
    %c0_1 = arith.constant 0 : index
    %0 = vector.load %arg2[%c0, %c0_0, %c0_1] : memref<1x128x128xf32, #tpu.memory_space<vmem>>, vector<1x128x128xf32>
    %1 = vector.shape_cast %0 : vector<1x128x128xf32> to vector<128x128xf32>
    %c0_2 = arith.constant 0 : index
    %c0_3 = arith.constant 0 : index
    %2 = vector.load %arg3[%c0_2, %c0_3] : memref<1x128xf32, #tpu.memory_space<vmem>>, vector<1x128xf32>
    %c0_4 = arith.constant 0 : index
    %c0_5 = arith.constant 0 : index
    %3 = vector.load %arg4[%c0_4, %c0_5] : memref<1x128xf32, #tpu.memory_space<vmem>>, vector<1x128xf32>
    %cst = arith.constant dense<0.000000e+00> : vector<128xf32>
    %4 = vector.multi_reduction <add>, %1, %cst [1] : vector<128x128xf32> to vector<128xf32>
    %5 = vector.shape_cast %4 : vector<128xf32> to vector<128x1xf32>
    %cst_6 = arith.constant 1.280000e+02 : f32
    %6 = vector.broadcast %cst_6 : f32 to vector<128x1xf32>
    %7 = arith.divf %5, %6 : vector<128x1xf32>
    %8 = vector.broadcast %7 : vector<128x1xf32> to vector<128x128xf32>
    %9 = arith.subf %1, %8 : vector<128x128xf32>
    %10 = arith.mulf %9, %9 : vector<128x128xf32>
    %cst_7 = arith.constant dense<0.000000e+00> : vector<128xf32>
    %11 = vector.multi_reduction <add>, %10, %cst_7 [1] : vector<128x128xf32> to vector<128xf32>
    %12 = vector.shape_cast %11 : vector<128xf32> to vector<128x1xf32>
    %cst_8 = arith.constant 1.280000e+02 : f32
    %13 = vector.broadcast %cst_8 : f32 to vector<128x1xf32>
    %14 = arith.divf %12, %13 : vector<128x1xf32>
    %15 = vector.broadcast %7 : vector<128x1xf32> to vector<128x128xf32>
    %16 = arith.subf %1, %15 : vector<128x128xf32>
    %cst_9 = arith.constant 9.99999997E-7 : f32
    %17 = vector.broadcast %cst_9 : f32 to vector<128x1xf32>
    %18 = arith.addf %14, %17 : vector<128x1xf32>
    %19 = math.rsqrt %18 : vector<128x1xf32>
    %20 = vector.broadcast %19 : vector<128x1xf32> to vector<128x128xf32>
    %21 = arith.mulf %16, %20 : vector<128x128xf32>
    %22 = vector.broadcast %2 : vector<1x128xf32> to vector<128x128xf32>
    %23 = arith.mulf %21, %22 : vector<128x128xf32>
    %24 = vector.broadcast %3 : vector<1x128xf32> to vector<128x128xf32>
    %25 = arith.addf %23, %24 : vector<128x128xf32>
    %26 = arith.truncf %25 : vector<128x128xf32> to vector<128x128xbf16>
    %c0_10 = arith.constant 0 : index
    %c0_11 = arith.constant 0 : index
    %27 = vector.load %arg5[%c0_10, %c0_11] : memref<128x256xbf16, #tpu.memory_space<vmem>>, vector<128x256xbf16>
    %cst_12 = arith.constant dense<0.000000e+00> : vector<128x256xf32>
    %28 = tpu.matmul %26, %27, %cst_12 {dimension_numbers = #tpu.dot_dimension_numbers<[1], [0], [0], [1], [0, 0, 1, 1], [], []>} : vector<128x128xbf16>, vector<128x256xbf16>, vector<128x256xf32> -> vector<128x256xf32>
    %c0_13 = arith.constant 0 : index
    %c0_14 = arith.constant 0 : index
    %29 = vector.load %arg6[%c0_13, %c0_14] : memref<1x256xf32, #tpu.memory_space<vmem>>, vector<1x256xf32>
    %30 = vector.broadcast %29 : vector<1x256xf32> to vector<128x256xf32>
    %31 = arith.addf %28, %30 : vector<128x256xf32>
    %32 = arith.truncf %31 : vector<128x256xf32> to vector<128x256xbf16>
    %c0_15 = arith.constant 0 : index
    %c0_16 = arith.constant 0 : index
    %c0_17 = arith.constant 0 : index
    %33 = vector.load %arg7[%c0_15, %c0_16, %c0_17] : memref<1x128x256xbf16, #tpu.memory_space<vmem>>, vector<1x128x256xbf16>
    %34 = vector.shape_cast %33 : vector<1x128x256xbf16> to vector<128x256xbf16>
    %35 = vector.shape_cast %32 : vector<128x256xbf16> to vector<1x128x256xbf16>
    tpu.vector_store %arg7[%c0_15, %c0_16, %c0_17], %35 {strides = array<i32>} : memref<1x128x256xbf16, #tpu.memory_space<vmem>>, vector<1x128x256xbf16>,
    return
  }
  func.func @transform_0(%arg0: i32, %arg1: i32) -> (i32, i32, i32) {
    %c0_i32 = arith.constant 0 : i32
    %c0_i32_0 = arith.constant 0 : i32
    return %arg0, %arg1, %c0_i32 : i32, i32, i32
  }
  func.func @transform_1(%arg0: i32, %arg1: i32) -> (i32, i32) {
    %c0_i32 = arith.constant 0 : i32
    %c0_i32_0 = arith.constant 0 : i32
    %c0_i32_1 = arith.constant 0 : i32
    return %c0_i32, %c0_i32_0 : i32, i32
  }
  func.func @transform_2(%arg0: i32, %arg1: i32) -> (i32, i32) {
    %c0_i32 = arith.constant 0 : i32
    %c0_i32_0 = arith.constant 0 : i32
    %c0_i32_1 = arith.constant 0 : i32
    return %c0_i32, %c0_i32_0 : i32, i32
  }
  func.func @transform_3(%arg0: i32, %arg1: i32) -> (i32, i32) {
    %c0_i32 = arith.constant 0 : i32
    %c0_i32_0 = arith.constant 0 : i32
    %c0_i32_1 = arith.constant 0 : i32
    return %c0_i32, %c0_i32_0 : i32, i32
  }
  func.func @transform_4(%arg0: i32, %arg1: i32) -> (i32, i32) {
    %c0_i32 = arith.constant 0 : i32
    %c0_i32_0 = arith.constant 0 : i32
    %c0_i32_1 = arith.constant 0 : i32
    return %c0_i32, %c0_i32_0 : i32, i32
  }
  func.func @transform_5(%arg0: i32, %arg1: i32) -> (i32, i32, i32) {
    %c0_i32 = arith.constant 0 : i32
    %c0_i32_0 = arith.constant 0 : i32
    return %arg0, %arg1, %c0_i32 : i32, i32, i32
  }
}

</mosaic_0001>

<bundles_post_ra>
// kernel: tpu_custom_call.1
= control target key start
LH: loop header
LB: loop body
LE: loop exit
PB: predicated region body
PF: predicated region fallthrough
CT: control target
= control target key end

     0   :  { %s1867_s0 = inlined_call_operand.hbm [shape: f32[2,128,128], index: 0, kind: input, shape index: {}]   ;;  %s1868_s1 = inlined_call_operand.vmem [shape: f32[1,128], index: 1, kind: input, shape index: {}]   ;;  %s1869_s2 = inlined_call_operand.hbm [shape: f32[1,128], index: 2, kind: input, shape index: {}]   ;;  %s1870_s3 = inlined_call_operand.hbm [shape: bf16[128,256], index: 3, kind: input, shape index: {}]   ;;  %s1871_s4 = inlined_call_operand.vmem [shape: f32[1,256], index: 4, kind: input, shape index: {}]   ;;  %s1872_s5 = inlined_call_operand.hbm [shape: bf16[2,128,256], index: 5, kind: output, shape index: {}]  }
   0x1   :  { %1882 = sst [smem:[#allocation14_spill]] %s1869_s2 }
   0x2   :  { %10 = vsyncpa [#allocation3], 0 }
   0x3   :  { %12 = vsyncpa [#allocation3 + $0x1], 0 }
   0x4   :  { %13 = vsyncpa [#allocation6], 0 }
   0x5   :  { %14 = vsyncpa [#allocation4], 0 }
   0x6   :  { %16 = vsyncpa [#allocation4 + $0x1], 0  ;;  %s1430_s18 = smov 0   ;;  %s1432_s19 = smov 0  }
   0x7   :  { %s1434_s20 = smov 0   ;;  %s1436_s21 = smov 0  }
   0x8   :  { %s1438_s22 = smov 0   ;;  %s1440_s23 = smov 0  }
   0x9 LB: > { %1883 = sst [smem:[#allocation12_spill]] %s1389_s23  ;;  %s994_s24 = sadd.s32 4294967295, %s1389_s23   ;;  %s1389_s23 = sphi %s1440_s23, %s22_s23   ;;  %s1385_s22 = sphi %s1438_s22, %s1908_s22   ;;  %s1381_s21 = sphi %s1436_s21, %s1907_s21   ;;  %s1377_s20 = sphi %s1434_s20, %s1906_s20   ;;  %s1373_s19 = sphi %s1432_s19, %s1905_s19   ;;  %s1369_s18 = sphi %s1430_s18, %s1904_s18  }
   0xa   : > { %s995_s25 = sadd.s32 4294967294, %s1389_s23   ;;  %p50_p0 = scmp.ne.s32.totalorder %s1377_s20, %s1373_s19 }
   0xb   : > { %p51_p1 = scmp.eq.s32.totalorder %s1389_s23, 0  ;;  %p56_p2 = scmp.ne.s32.totalorder %s1373_s19, %s1369_s18 }
   0xc   : > { %p1467_p3 = scmp.eq.s32.totalorder %s994_s24, 0  ;;  %p166_p4 = scmp.eq.s32.totalorder %s994_s24, 1 }
   0xd   : > { %p1471_p5 = por %p51_p1, %p50_p0  ;;  %p172_p6 = scmp.eq.s32.totalorder %s995_s25, 1 }
   0xe   : > { %s1884_s26 = scalar_select %p1467_p3, 1, 0 }
   0xf   : > { %p1477_p7 = por %p1467_p3, %p56_p2  ;;  %p1481_p8 = por %p166_p4, %p50_p0 }
  0x10   : > { %p1485_p9 = por %p172_p6, %p56_p2  ;;  %p996_p10 = scmp.ge.s32.totalorder %s1389_s23, 1 }
  0x11   : > { %s1886_s28 = scalar_select %p1477_p7, 1, 0 }
  0x12   : > { %s1887_s29 = scalar_select %p1481_p8, 1, 0 }
  0x13   : > { %s1888_s30 = scalar_select %p1485_p9, 1, 0 }
  0x14   : > { %p179_p11 = scmp.lt.s32.totalorder %s1389_s23, 3  ;;  %s1391_s7 = smov [#allocation5]  }
  0x15   : > { %1889 = sst [smem:[#allocation13_spill]] %s1888_s30  ;;  %s195_s8 = sshll.u32 %s1391_s7, 4  ;;  %s196_s8 = int_to_ptr.vmem [resolvable:$true] %s195_s8 }
  0x16   : > { %p1492_p13 = pnand %p996_p10, %p179_p11  ;;  %p1110_p1 = scmp.lt.s32.totalorder %s1389_s23, 2 }
  0x17   : > { %s1392_s10 = smov [#allocation7]   ;;  %s1236_s13 = scalar_lea.vmem %s196_s8, 16 }
  0x18   : > { %s1890_s6 = scalar_select %p1492_p13, 1, 0 }
  0x19   : > { %p1093_p0 = pneg %p1492_p13  ;;  %p1501_p4 = pnand %p1110_p1, %p1471_p5 }
  0x1a   : > { %s205_s11 = sshll.u32 %s1392_s10, 4  ;;  %p1237_p10 = scmp.ne.s32.totalorder %s196_s8, %s1236_s13  ;;  %s206_s11 = int_to_ptr.vmem [resolvable:$true] %s205_s11 }
  0x1b   : > { %s1891_s9 = scalar_select %p1501_p4, 1, 0 }
  0x1c   : > { %p1507_p2 = pnand %p1093_p0, %p1467_p3  ;;  %s1243_s14 = scalar_lea.vmem %s196_s8, 32 }
  0x1d   : > { %p1244_p1 = scmp.lt.s32.totalorder %s196_s8, %s196_s8  ;;  %p1245_p12 = scmp.lt.s32.totalorder %s1243_s14, %s1236_s13 }
  0x1e   : > { %p1227_p6 = pneg %p1507_p2 }
  0x1f   : > { %p1246_p9 = por %p1245_p12, %p1244_p1 }
  0x20   : > { %p1239_p5 = pnand %p1237_p10, %p1227_p6 }
  0x22   : > { %p1240_p11 = pneg %p1239_p5 }
  0x24   : > { %p1247_p8 = pnand %p1246_p9, %p1240_p11 }
  0x26   : > { %1250 = shalt.err (!%p1247_p8)
}
  0x27   : > { %s1893_s2 = sld [smem:[#allocation14_spill]]  ;;  %s1262_s17 = scalar_lea.vmem %s206_s11, 2048 }
  0x28   : > { %p1263_p0 = scmp.ne.s32.totalorder %s206_s11, %s1262_s17  ;;  %p1270_p5 = scmp.lt.s32.totalorder %s206_s11, %s206_s11 }
  0x29   : > { %p1271_p7 = scmp.lt.s32.totalorder %s1262_s17, %s1262_s17 }
  0x2a   : > { %p1265_p3 = pnand %p1263_p0, %p1227_p6 }
  0x2b   : > { %p1272_p13 = por %p1271_p7, %p1270_p5 }
  0x2c   : > { %p1266_p10 = pneg %p1265_p3 }
  0x2d   : > { %1096 = dma.hbm_to_vmem [thread:$0]  (!%p1507_p2), %s1893_s2, 16, %s196_s8, [#allocation6]  }
  0x2e   : > { %p1273_p4 = pnand %p1272_p13, %p1266_p10 }
  0x30   : > { %1276 = shalt.err (!%p1273_p4)
}
  0x31   : > { %s1393_s24 = smov 128   ;;  %s1394_s25 = smov 8  }
  0x32   : > { %1099 = dma.hbm_to_vmem [thread:$0]  (!%p1507_p2), %s1870_s3, 2048, %s206_s11, [#allocation6], %s1393_s24, %s1393_s24, %s1394_s25  }
  0x33   : > { %s222_s8 = sand.u32 1, %s1377_s20   ;;  %s34_s10 = sadd.s32 1, %s1385_s22 }
  0x34   : > { %s1000_s13 = sshll.u32 %s222_s8, 7  ;;  %p36_p3 = scmp.ge.s32.totalorder %s34_s10, 2 }
  0x35   : > { %s1047_s14 = sshll.u32 %s1385_s22, 11  ;;  %s226_s15 = scalar_lea.vmem [#allocation2], %s1000_s13 }
  0x36   : > { %s235_s16 = sshll.u32 %s226_s15, 4  ;;  %s1910_s10 = smov (%p36_p3, %s34_s10), 0  ;;  %s236_s16 = int_to_ptr.vmem [resolvable:$true] %s235_s16 }
  0x37   : > { %s234_s12 = scalar_lea.hbm %s1867_s0, %s1047_s14  ;;  %s43_s23 = sadd.s32 1, %s1377_s20 }
  0x38   : > { %s38_s30 = ssub.s32 %s1385_s22, %s1910_s10  ;;  %s223_s11 = scalar_lea.sflag [#allocation3], %s222_s8 }
  0x39   : > { %p1543_p7 = scmp.eq.s32.totalorder %s38_s30, 0  ;;  %p1895_p8 = scmp.ne.s32.totalorder %s1891_s9, 0 }
  0x3a   : > { %s1290_s7 = scalar_lea.vmem %s236_s16, 2048  ;;  %s1395_s13 = smov [#allocation2]  }
  0x3b   : > { %p1279_p9 = pneg %p1895_p8  ;;  %p1291_p12 = scmp.ne.s32.totalorder %s236_s16, %s1290_s7 }
  0x3c   : > { %s1295_s15 = sshll.u32 %s1395_s13, 4  ;;  %s1296_s15 = int_to_ptr.vmem [resolvable:$false] %s1295_s15 }
  0x3d   : > { %p1293_p13 = pnand %p1291_p12, %p1279_p9  ;;  %s1297_s2 = scalar_lea.vmem %s1296_s15, 4096 }
  0x3e   : > { %p1298_p2 = scmp.lt.s32.totalorder %s236_s16, %s1296_s15  ;;  %p1299_p6 = scmp.lt.s32.totalorder %s1297_s2, %s1290_s7 }
  0x3f   : > { %p1294_p4 = pneg %p1293_p13 }
  0x40   : > { %p1300_p11 = por %p1299_p6, %p1298_p2 }
  0x42   : > { %p1301_p1 = pnand %p1300_p11, %p1294_p4 }
  0x44   : > { %1304 = shalt.err (!%p1301_p1)
}
  0x45   : > { %1103 = dma.hbm_to_vmem [thread:$0]  (!%p1895_p8), %s234_s12, 2048, %s236_s16, %s223_s11, %s1393_s24, %s1393_s24, %s1394_s25  }
  0x46   : > { %s1557_s30 = scalar_select %p1543_p7, %s1377_s20, %s43_s23  }
  0x47   : > { %p1896_p0 = scmp.ne.s32.totalorder %s1890_s6, 0 }
  0x48   : > { %s1562_s8 = sand.u32 (!%p1896_p0), 1, %s1373_s19   ;;  %p1897_p10 = scmp.ne.s32.totalorder (!%p1896_p0), %s1886_s28, 0 }
  0x49   : > { %247 = sbr.rel (%p1896_p0) target bundleno = 641 (0x281), region = 40  ;;  %s1004_s9 = sshll.u32 (!%p1896_p0), %s1562_s8, 7 }
  0x4a   : > { %s250_s14 = scalar_lea.sflag (!%p1896_p0), [#allocation3], %s1562_s8  ;;  %s1568_s17 = scalar_lea.vmem (!%p1896_p0), [#allocation2], %s1004_s9 }
  0x4e   : > { %1356 = dma.done.wait (%p1897_p10), %s250_s14, 2048  }
  0x4f   : > { %1358 = vsyncadd (%p1897_p10), %s250_s14, 4294965248  ;;  %p1898_p5 = scmp.ne.s32.totalorder %s1884_s26, 0 }
  0x51   : > { %1360 = dma.done.wait (%p1898_p5), [#allocation6], 2064  }
  0x52   : > { %1362 = vsyncadd (%p1898_p5), [#allocation6], 4294965232  ;;  %v291_v0 = vld [vmem:[%s1568_s17] sm:$0xff]  ;;  %v292_v2 = vld [vmem:[%s1568_s17 + $0x8] sm:$0xff]  ;;  %s1764_s24 = scalar_lea.vmem [#allocation8], %s1004_s9  ;;  %s1064_s25 = sshll.u32 %s1381_s21, 11 }
  0x53   : > { %v299_v1 = vld [vmem:[%s1568_s17 + $0x40] sm:$0xff]  ;;  %309 = vadd.xlane.f32.xlu0 %v291_v0  ;;  %v300_v3 = vld [vmem:[%s1568_s17 + $0x48] sm:$0xff]  ;;  %v293_v4 = vld [vmem:[%s1568_s17 + $0x10] sm:$0xff]  ;;  %s888_s16 = sshll.u32 %s1764_s24, 4  ;;  %s1816_s11 = scalar_lea.hbm %s1872_s5, %s1064_s25  ;;  %s1818_s16 = int_to_ptr.vmem [resolvable:$true] %s888_s16 }
  0x54   : > { %325 = vadd.xlane.f32.xlu1 %v299_v1  ;;  %v294_v5 = vld [vmem:[%s1568_s17 + $0x18] sm:$0xff]  ;;  %v301_v6 = vld [vmem:[%s1568_s17 + $0x50] sm:$0xff]  ;;  %v1587_v8 = vld [vmem:[%s1568_s17 + $0x20] sm:$0xff]  ;;  %s872_s21 = scalar_lea.sflag [#allocation4], %s1562_s8  ;;  %s1305_s7 = scalar_lea.vmem %s1818_s16, 2048 }
  0x55   : > { %v302_v7 = vld [vmem:[%s1568_s17 + $0x58] sm:$0xff]  ;;  %v1590_v9 = vld [vmem:[%s1568_s17 + $0x28] sm:$0xff]  ;;  %v1595_v10 = vld [vmem:[%s1568_s17 + $0x60] sm:$0xff]  ;;  %p1306_p3 = scmp.ne.s32.totalorder %s1818_s16, %s1305_s7  ;;  %p1899_p7 = scmp.ne.s32.totalorder %s1887_s29, 0 }
  0x56   : > { %v1598_v11 = vld [vmem:[%s1568_s17 + $0x68] sm:$0xff]  ;;  %v1603_v12 = vld [vmem:[%s1568_s17 + $0x30] sm:$0xff]  ;;  %v1606_v13 = vld [vmem:[%s1568_s17 + $0x38] sm:$0xff]  ;;  %s1397_s13 = smov [#allocation8]  }
  0x57   : > { %311 = vadd.xlane.f32.xlu0 %v292_v2  ;;  %v1611_v14 = vld [vmem:[%s1568_s17 + $0x70] sm:$0xff]  ;;  %v1614_v15 = vld [vmem:[%s1568_s17 + $0x78] sm:$0xff]  ;;  %v1174_v54 = vld [vmem:[#allocation7 + $0x60] ss:$8 sps:$4 sm:$0xff]   ;;  %p1307_p8 = pnand %p1306_p3, %p1899_p7  ;;  %s1309_s15 = sshll.u32 %s1397_s13, 4  ;;  %s1310_s15 = int_to_ptr.vmem [resolvable:$false] %s1309_s15 }
  0x58   : > { %327 = vadd.xlane.f32.xlu1 %v300_v3  ;;  %v1169_v16 = vld [vmem:[#allocation7 + $0x74] ss:$8 sps:$4 sm:$0xff]   ;;  %v1171_v17 = vld [vmem:[#allocation7 + $0x70] ss:$8 sps:$4 sm:$0xff]   ;;  %v1172_v53 = vld [vmem:[#allocation7 + $0x64] ss:$8 sps:$4 sm:$0xff]   ;;  %p1312_p12 = scmp.lt.s32.totalorder %s1818_s16, %s1310_s15 }
  0x59   : > { %646 = vmatprep.subr.bf16.mxu0 %v1169_v16  ;;  %1065 = vmatprep.subr.bf16.mxu1 %v1169_v16  ;;  %v1175_v63 = vld [vmem:[#allocation7 + $0x54] ss:$8 sps:$4 sm:$0xff]   ;;  %p1308_p9 = pneg %p1307_p8  ;;  %s1311_s2 = scalar_lea.vmem %s1310_s15, 4096 }
  0x5a   : > { %647 = vmatpush1.bf16.msra.mxu0 %v1171_v17  ;;  %1073 = vmatpush1.bf16.msra.mxu1 %v1171_v17  ;;  %v1180_v17 = vld [vmem:[#allocation7 + $0x40] ss:$8 sps:$4 sm:$0xff]   ;;  %p1313_p13 = scmp.lt.s32.totalorder %s1311_s2, %s1305_s7 }
  0x5b   : > { %313 = vadd.xlane.f32.xlu0 %v293_v4  ;;  %648 = vmatprep.subr.bf16.mxu0 %v1172_v53 }
  0x5c   : > { %315 = vadd.xlane.f32.xlu1 %v294_v5  ;;  %1066 = vmatprep.subr.bf16.mxu1 %v1172_v53  ;;  %p1314_p4 = por %p1313_p13, %p1312_p12 }
  0x5e   : > { %649 = vmatpush1.bf16.msra.mxu0 %v1174_v54  ;;  %1074 = vmatpush1.bf16.msra.mxu1 %v1174_v54  ;;  %p1315_p2 = pnand %p1314_p4, %p1308_p9 }
  0x5f   : > { %329 = vadd.xlane.f32.xlu0 %v301_v6  ;;  %650 = vmatprep.subr.bf16.mxu0 %v1175_v63 }
  0x60   : > { %331 = vadd.xlane.f32.xlu1 %v302_v7  ;;  %1067 = vmatprep.subr.bf16.mxu1 %v1175_v63 }
  0x63   : > { %317 = vadd.xlane.f32.xlu0 %v1587_v8 }
  0x64   : > { %319 = vadd.xlane.f32.xlu1 %v1590_v9 }
  0x67   : > { %333 = vadd.xlane.f32.xlu0 %v1595_v10 }
  0x68   : > { %335 = vadd.xlane.f32.xlu1 %v1598_v11 }
  0x6b   : > { %321 = vadd.xlane.f32.xlu0 %v1603_v12 }
  0x6c   : > { %323 = vadd.xlane.f32.xlu1 %v1606_v13 }
  0x6f   : > { %337 = vadd.xlane.f32.xlu0 %v1611_v14 }
  0x70   : > { %339 = vadd.xlane.f32.xlu1 %v1614_v15 }
  0xdc   : > { %v310_v18 = vpop.xlane.xlu0 %309 }
  0xdd   : > { %v326_v19 = vpop.xlane.xlu1 %325  ;;  %v342_v20 = vmul.f32 0.0078125, %v310_v18 }
  0xde   : > { %v350_v21 = vmul.f32 0.0078125, %v326_v19 }
  0xdf   : > { %v1618_v22 = vsub.f32 %v291_v0, %v342_v20 }
  0xe0   : > { %v1620_v23 = vsub.f32 %v299_v1, %v350_v21  ;;  %v312_v24 = vpop.xlane.xlu0 %311 }
  0xe1   : > { %v328_v25 = vpop.xlane.xlu1 %327  ;;  %v343_v26 = vmul.f32 0.0078125, %v312_v24  ;;  %v374_v27 = vmul.f32 %v1618_v22, %v1618_v22 }
  0xe2   : > { %v351_v28 = vmul.f32 0.0078125, %v328_v25  ;;  %v382_v31 = vmul.f32 %v1620_v23, %v1620_v23 }
  0xe3   : > { %v1624_v29 = vsub.f32 %v292_v2, %v343_v26  ;;  %390 = vadd.xlane.f32.xlu0 %v374_v27  ;;  %v1183_v27 = vld [vmem:[#allocation7 + $0x30] ss:$8 sps:$4 sm:$0xff]  }
  0xe4   : > { %v1626_v30 = vsub.f32 %v300_v3, %v351_v28  ;;  %v314_v32 = vpop.xlane.xlu0 %313  ;;  %v1177_v3 = vld [vmem:[#allocation7 + $0x50] ss:$8 sps:$4 sm:$0xff]  }
  0xe5   : > { %v316_v33 = vpop.xlane.xlu1 %315  ;;  %v344_v34 = vmul.f32 0.0078125, %v314_v32  ;;  %v375_v35 = vmul.f32 %v1624_v29, %v1624_v29  ;;  %651 = vmatpush1.bf16.msra.mxu0 %v1177_v3  ;;  %1075 = vmatpush1.bf16.msra.mxu1 %v1177_v3  ;;  %v1186_v32 = vld [vmem:[#allocation7 + $0x20] ss:$8 sps:$4 sm:$0xff]  }
  0xe6   : > { %v345_v36 = vmul.f32 0.0078125, %v316_v33  ;;  %v383_v39 = vmul.f32 %v1626_v30, %v1626_v30  ;;  %v1189_v33 = vld [vmem:[#allocation7 + $0x10] ss:$8 sps:$4 sm:$0xff]  }
  0xe7   : > { %v1632_v37 = vsub.f32 %v293_v4, %v344_v34  ;;  %406 = vadd.xlane.f32.xlu0 %v382_v31  ;;  %392 = vadd.xlane.f32.xlu1 %v375_v35  ;;  %v1184_v31 = vld [vmem:[#allocation7 + $0x24] ss:$8 sps:$4 sm:$0xff]   ;;  %v1192_v35 = vld [vmem:[#allocation7] ss:$8 sps:$4 sm:$0xff]  }
  0xe8   : > { %v1634_v38 = vsub.f32 %v294_v5, %v345_v36  ;;  %v330_v40 = vpop.xlane.xlu0 %329  ;;  %v1190_v34 = vld [vmem:[#allocation7 + $0x4] ss:$8 sps:$4 sm:$0xff]   ;;  %v1396_v36 = vmov 0  }
  0xe9   : > { %v332_v41 = vpop.xlane.xlu1 %331  ;;  %v352_v42 = vmul.f32 0.0078125, %v330_v40  ;;  %v376_v43 = vmul.f32 %v1632_v37, %v1632_v37  ;;  %678 = vmatprep.mubr.bf16.mxu0 %v1396_v36  ;;  %718 = vmatprep.mubr.bf16.mxu1 %v1396_v36 }
  0xea   : > { %v353_v44 = vmul.f32 0.0078125, %v332_v41  ;;  %v377_v47 = vmul.f32 %v1634_v38, %v1634_v38 }
  0xeb   : > { %v1640_v45 = vsub.f32 %v301_v6, %v352_v42  ;;  %408 = vadd.xlane.f32.xlu1 %v383_v39  ;;  %394 = vadd.xlane.f32.xlu0 %v376_v43 }
  0xec   : > { %v1642_v46 = vsub.f32 %v302_v7, %v353_v44  ;;  %v318_v48 = vpop.xlane.xlu0 %317 }
  0xed   : > { %v320_v49 = vpop.xlane.xlu1 %319  ;;  %v346_v50 = vmul.f32 0.0078125, %v318_v48  ;;  %v384_v51 = vmul.f32 %v1640_v45, %v1640_v45 }
  0xee   : > { %v347_v52 = vmul.f32 0.0078125, %v320_v49  ;;  %v385_v57 = vmul.f32 %v1642_v46, %v1642_v46 }
  0xef   : > { %v1649_v55 = vsub.f32 %v1587_v8, %v346_v50  ;;  %396 = vadd.xlane.f32.xlu1 %v377_v47  ;;  %410 = vadd.xlane.f32.xlu0 %v384_v51 }
  0xf0   : > { %v1652_v56 = vsub.f32 %v1590_v9, %v347_v52  ;;  %v334_v58 = vpop.xlane.xlu0 %333  ;;  %v1178_v9 = vld [vmem:[#allocation7 + $0x44] ss:$8 sps:$4 sm:$0xff]  }
  0xf1   : > { %v336_v59 = vpop.xlane.xlu1 %335  ;;  %v354_v60 = vmul.f32 0.0078125, %v334_v58  ;;  %v378_v61 = vmul.f32 %v1649_v55, %v1649_v55  ;;  %652 = vmatprep.subr.bf16.mxu0 %v1178_v9  ;;  %1068 = vmatprep.subr.bf16.mxu1 %v1178_v9  ;;  %v1695_v9 = vld [vmem:[%s1868_s1] ss:$0 sm:$0xff] }
  0xf2   : > { %v355_v62 = vmul.f32 0.0078125, %v336_v59  ;;  %v379_v2 = vmul.f32 %v1652_v56, %v1652_v56  ;;  %653 = vmatpush1.bf16.msra.mxu0 %v1180_v17  ;;  %1076 = vmatpush1.bf16.msra.mxu1 %v1180_v17 }
  0xf3   : > { %v1659_v0 = vsub.f32 %v1595_v10, %v354_v60  ;;  %412 = vadd.xlane.f32.xlu1 %v385_v57  ;;  %398 = vadd.xlane.f32.xlu0 %v378_v61 }
  0xf4   : > { %v1662_v1 = vsub.f32 %v1598_v11, %v355_v62  ;;  %v322_v4 = vpop.xlane.xlu0 %321 }
  0xf5   : > { %v324_v5 = vpop.xlane.xlu1 %323  ;;  %v348_v6 = vmul.f32 0.0078125, %v322_v4  ;;  %v386_v7 = vmul.f32 %v1659_v0, %v1659_v0 }
  0xf6   : > { %v349_v8 = vmul.f32 0.0078125, %v324_v5  ;;  %v387_v16 = vmul.f32 %v1662_v1, %v1662_v1 }
  0xf7   : > { %v1669_v10 = vsub.f32 %v1603_v12, %v348_v6  ;;  %400 = vadd.xlane.f32.xlu1 %v379_v2  ;;  %414 = vadd.xlane.f32.xlu0 %v386_v7  ;;  %v1181_v12 = vld [vmem:[#allocation7 + $0x34] ss:$8 sps:$4 sm:$0xff]  }
  0xf8   : > { %v1672_v11 = vsub.f32 %v1606_v13, %v349_v8  ;;  %v338_v18 = vpop.xlane.xlu0 %337  ;;  %654 = vmatprep.subr.bf16.mxu0 %v1181_v12  ;;  %1069 = vmatprep.subr.bf16.mxu1 %v1181_v12 }
  0xf9   : > { %v340_v19 = vpop.xlane.xlu1 %339  ;;  %v356_v20 = vmul.f32 0.0078125, %v338_v18  ;;  %v380_v21 = vmul.f32 %v1669_v10, %v1669_v10  ;;  %655 = vmatpush1.bf16.msra.mxu0 %v1183_v27  ;;  %1077 = vmatpush1.bf16.msra.mxu1 %v1183_v27 }
  0xfa   : > { %v357_v24 = vmul.f32 0.0078125, %v340_v19  ;;  %v381_v26 = vmul.f32 %v1672_v11, %v1672_v11  ;;  %656 = vmatprep.subr.bf16.mxu0 %v1184_v31  ;;  %1070 = vmatprep.subr.bf16.mxu1 %v1184_v31 }
  0xfb   : > { %v1679_v25 = vsub.f32 %v1611_v14, %v356_v20  ;;  %416 = vadd.xlane.f32.xlu1 %v387_v16  ;;  %402 = vadd.xlane.f32.xlu0 %v380_v21 }
  0xfc   : > { %v1682_v13 = vsub.f32 %v1614_v15, %v357_v24  ;;  %v1187_v15 = vld [vmem:[#allocation7 + $0x14] ss:$8 sps:$4 sm:$0xff]  }
  0xfd   : > { %v388_v28 = vmul.f32 %v1679_v25, %v1679_v25  ;;  %657 = vmatpush1.bf16.msra.mxu0 %v1186_v32  ;;  %1078 = vmatpush1.bf16.msra.mxu1 %v1186_v32 }
  0xfe   : > { %v389_v14 = vmul.f32 %v1682_v13, %v1682_v13  ;;  %658 = vmatprep.subr.bf16.mxu0 %v1187_v15  ;;  %1071 = vmatprep.subr.bf16.mxu1 %v1187_v15 }
  0xff   : > { %404 = vadd.xlane.f32.xlu1 %v381_v26  ;;  %418 = vadd.xlane.f32.xlu0 %v388_v28  ;;  %v1699_v28 = vld [vmem:[#allocation5] ss:$0 sm:$0xff] }
 0x101   : > { %659 = vmatpush1.bf16.msra.mxu0 %v1189_v33  ;;  %1079 = vmatpush1.bf16.msra.mxu1 %v1189_v33 }
 0x102   : > { %660 = vmatprep.subr.bf16.mxu0 %v1190_v34  ;;  %1072 = vmatprep.subr.bf16.mxu1 %v1190_v34 }
 0x103   : > { %420 = vadd.xlane.f32.xlu1 %v389_v14 }
 0x105   : > { %661 = vmatpush1.bf16.msra.mxu0 %v1192_v35  ;;  %1080 = vmatpush1.bf16.msra.mxu1 %v1192_v35 }
 0x16c   : > { %v391_v39 = vpop.xlane.xlu0 %390 }
 0x16d   : > { %v422_v40 = vmul.f32 0.0078125, %v391_v39 }
 0x16f   : > { %v438_v41 = vadd.f32 1e-06, %v422_v40 }
 0x170   : > { %v393_v42 = vpop.xlane.xlu1 %392  ;;  %v407_v43 = vpop.xlane.xlu0 %406 }
 0x171   : > { %1193 = vrsqrt.f32 %v438_v41  ;;  %v423_v44 = vmul.f32 0.0078125, %v393_v42  ;;  %v430_v47 = vmul.f32 0.0078125, %v407_v43 }
 0x173   : > { %v439_v48 = vadd.f32 1e-06, %v423_v44  ;;  %v446_v49 = vadd.f32 1e-06, %v430_v47 }
 0x174   : > { %v409_v50 = vpop.xlane.xlu1 %408  ;;  %v395_v51 = vpop.xlane.xlu0 %394 }
 0x175   : > { %1195 = vrsqrt.f32 %v439_v48  ;;  %v431_v52 = vmul.f32 0.0078125, %v409_v50  ;;  %v424_v53 = vmul.f32 0.0078125, %v395_v51 }
 0x176   : > { %1197 = vrsqrt.f32 %v446_v49 }
 0x177   : > { %v447_v54 = vadd.f32 1e-06, %v431_v52  ;;  %v440_v57 = vadd.f32 1e-06, %v424_v53 }
 0x178   : > { %v397_v58 = vpop.xlane.xlu1 %396  ;;  %v411_v59 = vpop.xlane.xlu0 %410 }
 0x179   : > { %1199 = vrsqrt.f32 %v447_v54  ;;  %v425_v60 = vmul.f32 0.0078125, %v397_v58  ;;  %v432_v61 = vmul.f32 0.0078125, %v411_v59 }
 0x17a   : > { %1201 = vrsqrt.f32 %v440_v57 }
 0x17b   : > { %v441_v62 = vadd.f32 1e-06, %v425_v60  ;;  %v448_v63 = vadd.f32 1e-06, %v432_v61 }
 0x17c   : > { %v413_v2 = vpop.xlane.xlu1 %412  ;;  %v399_v3 = vpop.xlane.xlu0 %398 }
 0x17d   : > { %1203 = vrsqrt.f32 %v441_v62  ;;  %v433_v4 = vmul.f32 0.0078125, %v413_v2  ;;  %v426_v5 = vmul.f32 0.0078125, %v399_v3 }
 0x17e   : > { %v1194_v6 = vpop.eup %1193  ;;  %1205 = vrsqrt.f32 %v448_v63 }
 0x17f   : > { %v449_v7 = vadd.f32 1e-06, %v433_v4  ;;  %v442_v8 = vadd.f32 1e-06, %v426_v5  ;;  %v470_v16 = vmul.f32 %v1194_v6, %v1618_v22 }
 0x180   : > { %v401_v17 = vpop.xlane.xlu1 %400  ;;  %v415_v18 = vpop.xlane.xlu0 %414 }
 0x181   : > { %1207 = vrsqrt.f32 %v449_v7  ;;  %v427_v19 = vmul.f32 0.0078125, %v401_v17  ;;  %v434_v20 = vmul.f32 0.0078125, %v415_v18  ;;  %v492_v24 = vmul.f32 %v1695_v9, %v470_v16 }
 0x182   : > { %v1196_v21 = vpop.eup %1195  ;;  %1209 = vrsqrt.f32 %v442_v8 }
 0x183   : > { %v1198_v12 = vpop.eup %1197  ;;  %v443_v26 = vadd.f32 1e-06, %v427_v19  ;;  %v450_v27 = vadd.f32 1e-06, %v434_v20  ;;  %v471_v31 = vmul.f32 %v1196_v21, %v1624_v29  ;;  %v514_v39 = vadd.f32 %v1699_v28, %v492_v24 }
 0x184   : > { %v417_v14 = vpop.xlane.xlu1 %416  ;;  %v403_v32 = vpop.xlane.xlu0 %402  ;;  %v478_v22 = vmul.f32 %v1198_v12, %v1620_v23 }
 0x185   : > { %1211 = vrsqrt.f32 %v443_v26  ;;  %v435_v15 = vmul.f32 0.0078125, %v417_v14  ;;  %v428_v33 = vmul.f32 0.0078125, %v403_v32  ;;  %v493_v34 = vmul.f32 %v1695_v9, %v471_v31 }
 0x186   : > { %v1200_v35 = vpop.eup %1199  ;;  %1213 = vrsqrt.f32 %v450_v27  ;;  %v500_v23 = vmul.f32 %v1695_v9, %v478_v22 }
 0x187   : > { %v1202_v40 = vpop.eup %1201  ;;  %v451_v41 = vadd.f32 1e-06, %v435_v15  ;;  %v444_v42 = vadd.f32 1e-06, %v428_v33  ;;  %v515_v43 = vadd.f32 %v1699_v28, %v493_v34  ;;  %v479_v29 = vmul.f32 %v1200_v35, %v1626_v30 }
 0x188   : > { %v405_v44 = vpop.xlane.xlu1 %404  ;;  %v419_v47 = vpop.xlane.xlu0 %418  ;;  %v472_v48 = vmul.f32 %v1202_v40, %v1632_v37  ;;  %v522_v61 = vadd.f32 %v1699_v28, %v500_v23 }
 0x189   : > { %1215 = vrsqrt.f32 %v451_v41  ;;  %v429_v49 = vmul.f32 0.0078125, %v405_v44  ;;  %v436_v50 = vmul.f32 0.0078125, %v419_v47  ;;  %v530_v51 = vpack.c.bf16 %v515_v43, %v514_v39 }
 0x18a   : > { %v1204_v52 = vpop.eup %1203  ;;  %1217 = vrsqrt.f32 %v444_v42  ;;  %v501_v53 = vmul.f32 %v1695_v9, %v479_v29  ;;  %v494_v54 = vmul.f32 %v1695_v9, %v472_v48 }
 0x18b   : > { %v1206_v57 = vpop.eup %1205  ;;  %v445_v58 = vadd.f32 1e-06, %v429_v49  ;;  %v452_v59 = vadd.f32 1e-06, %v436_v50  ;;  %679 = vmatmul.mubr.bf16.vlgmr.msra.gmra.mxu0 %v530_v51  ;;  %v473_v30 = vmul.f32 %v1204_v52, %v1634_v38 }
 0x18c   : > { %v421_v60 = vpop.xlane.xlu1 %420  ;;  %v523_v37 = vadd.f32 %v1699_v28, %v501_v53  ;;  %688 = vmatprep.mubr.bf16.mxu0 %v1396_v36  ;;  %v480_v62 = vmul.f32 %v1206_v57, %v1640_v45  ;;  %v516_v5 = vadd.f32 %v1699_v28, %v494_v54  ;;  %v556_v53 = vlaneseq }
 0x18d   : > { %1219 = vrsqrt.f32 %v445_v58  ;;  %v437_v63 = vmul.f32 0.0078125, %v421_v60  ;;  %v495_v2 = vmul.f32 %v1695_v9, %v473_v30  ;;  %v554_v58 = vld [vmem:[%s1871_s4] sm:$0x3] }
 0x18e   : > { %v1208_v3 = vpop.eup %1207  ;;  %1221 = vrsqrt.f32 %v452_v59  ;;  %v534_v4 = vpack.c.bf16 %v523_v37, %v522_v61  ;;  %v502_v16 = vmul.f32 %v1695_v9, %v480_v62  ;;  %v557_v54 = vshrl.u32 %v556_v53, 7 }
 0x18f   : > { %v1210_v6 = vpop.eup %1209  ;;  %v453_v38 = vadd.f32 1e-06, %v437_v63  ;;  %v517_v7 = vadd.f32 %v1699_v28, %v495_v2  ;;  %v481_v8 = vmul.f32 %v1208_v3, %v1642_v46 }
 0x190   : > { %719 = vmatmul.mubr.bf16.vlgmr.msra.gmra.mxu1 %v534_v4  ;;  %v474_v45 = vmul.f32 %v1210_v6, %v1649_v55  ;;  %v524_v21 = vadd.f32 %v1699_v28, %v502_v16  ;;  %v558_v57 = vsub.s32 0, %v557_v54 }
 0x191   : > { %1223 = vrsqrt.f32 %v453_v38  ;;  %v531_v17 = vpack.c.bf16 %v517_v7, %v516_v5  ;;  %728 = vmatprep.mubr.bf16.mxu1 %v1396_v36  ;;  %v503_v18 = vmul.f32 %v1695_v9, %v481_v8 }
 0x192   : > { %v1212_v19 = vpop.eup %1211  ;;  %v496_v12 = vmul.f32 %v1695_v9, %v474_v45  ;;  %v1756_v59 = vrot.slane %v554_v58, %v558_v57 }
 0x193   : > { %v1214_v20 = vpop.eup %1213  ;;  %689 = vmatmul.mubr.bf16.gmra.mxu0 %v531_v17  ;;  %v525_v24 = vadd.f32 %v1699_v28, %v503_v18  ;;  %v475_v46 = vmul.f32 %v1212_v19, %v1652_v56 }
 0x194   : > { %698 = vmatprep.mubr.bf16.mxu0 %v1396_v36  ;;  %v482_v55 = vmul.f32 %v1214_v20, %v1659_v0  ;;  %v518_v32 = vadd.f32 %v1699_v28, %v496_v12 }
 0x195   : > { %v535_v26 = vpack.c.bf16 %v525_v24, %v524_v21  ;;  %v497_v27 = vmul.f32 %v1695_v9, %v475_v46 }
 0x196   : > { %v1216_v31 = vpop.eup %1215  ;;  %v504_v33 = vmul.f32 %v1695_v9, %v482_v55 }
 0x197   : > { %v1218_v14 = vpop.eup %1217  ;;  %v519_v22 = vadd.f32 %v1699_v28, %v497_v27  ;;  %v483_v15 = vmul.f32 %v1216_v31, %v1662_v1 }
 0x198   : > { %729 = vmatmul.mubr.bf16.gmra.mxu1 %v535_v26  ;;  %v476_v56 = vmul.f32 %v1218_v14, %v1669_v10  ;;  %v526_v40 = vadd.f32 %v1699_v28, %v504_v33 }
 0x199   : > { %v532_v34 = vpack.c.bf16 %v519_v22, %v518_v32  ;;  %738 = vmatprep.mubr.bf16.mxu1 %v1396_v36  ;;  %v505_v0 = vmul.f32 %v1695_v9, %v483_v15 }
 0x19a   : > { %v1220_v35 = vpop.eup %1219  ;;  %v498_v1 = vmul.f32 %v1695_v9, %v476_v56 }
 0x19b   : > { %v1222_v39 = vpop.eup %1221  ;;  %699 = vmatmul.mubr.bf16.gmra.mxu0 %v532_v34  ;;  %v527_v41 = vadd.f32 %v1699_v28, %v505_v0  ;;  %v477_v42 = vmul.f32 %v1220_v35, %v1672_v11 }
 0x19c   : > { %708 = vmatprep.mubr.bf16.mxu0 %v1396_v36  ;;  %v484_v10 = vmul.f32 %v1222_v39, %v1679_v25  ;;  %v520_v47 = vadd.f32 %v1699_v28, %v498_v1 }
 0x19d   : > { %v536_v43 = vpack.c.bf16 %v527_v41, %v526_v40  ;;  %v499_v29 = vmul.f32 %v1695_v9, %v477_v42 }
 0x19e   : > { %v1224_v44 = vpop.eup %1223  ;;  %v506_v49 = vmul.f32 %v1695_v9, %v484_v10 }
 0x19f   : > { %v521_v23 = vadd.f32 %v1699_v28, %v499_v29  ;;  %v485_v48 = vmul.f32 %v1224_v44, %v1682_v13  ;;  %v562_v13 = vsub.s32 1, %v557_v54 }
 0x1a0   : > { %739 = vmatmul.mubr.bf16.gmra.mxu1 %v536_v43  ;;  %v528_v25 = vadd.f32 %v1699_v28, %v506_v49 }
 0x1a1   : > { %v533_v11 = vpack.c.bf16 %v521_v23, %v520_v47  ;;  %748 = vmatprep.mubr.bf16.mxu1 %v1396_v36  ;;  %v507_v50 = vmul.f32 %v1695_v9, %v485_v48  ;;  %v1758_v36 = vrot.slane %v554_v58, %v562_v13 }
 0x1a3   : > { %709 = vmatmul.mubr.bf16.gmra.mxu0 %v533_v11  ;;  %v529_v51 = vadd.f32 %v1699_v28, %v507_v50 }
 0x1a5   : > { %v537_v52 = vpack.c.bf16 %v529_v51, %v528_v25 }
 0x1a8   : > { %749 = vmatmul.mubr.bf16.gmra.mxu1 %v537_v52 }
 0x24b   : > { %v680_v9 = vpop.f32.mrf.mxu0 }
 0x24c   : > { %v681_v60 = vadd.f32 %v680_v9, %v1756_v59 }
 0x24d   : > { %v682_v30 = vpop.f32.mrf.mxu0 }
 0x24e   : > { %v683_v28 = vadd.f32 %v682_v30, %v1758_v36 }
 0x24f   : > { %v684_v61 = vpop.f32.mrf.mxu0 }
 0x250   : > { %v1048_v37 = vpack.c.bf16 %v683_v28, %v681_v60  ;;  %v720_v62 = vpop.f32.mrf.mxu1  ;;  %v685_v2 = vadd.f32 %v684_v61, %v1756_v59 }
 0x251   : > { %v686_v63 = vpop.f32.mrf.mxu0  ;;  %v721_v5 = vadd.f32 %v720_v62, %v1756_v59 }
 0x252   : > { %855 = vst [vmem:[%s1764_s24] sm:$0xff] %v1048_v37  ;;  %v687_v3 = vadd.f32 %v686_v63, %v1758_v36  ;;  %v722_v4 = vpop.f32.mrf.mxu1 }
 0x253   : > { %v723_v6 = vadd.f32 %v722_v4, %v1758_v36  ;;  %v690_v38 = vpop.f32.mrf.mxu0 }
 0x254   : > { %v1049_v7 = vpack.c.bf16 %v687_v3, %v685_v2  ;;  %v724_v8 = vpop.f32.mrf.mxu1  ;;  %v691_v17 = vadd.f32 %v690_v38, %v1756_v59 }
 0x255   : > { %v1056_v16 = vpack.c.bf16 %v723_v6, %v721_v5  ;;  %v692_v45 = vpop.f32.mrf.mxu0  ;;  %v725_v20 = vadd.f32 %v724_v8, %v1756_v59 }
 0x256   : > { %856 = vst [vmem:[%s1764_s24 + $0x8] sm:$0xff] %v1049_v7  ;;  %v693_v18 = vadd.f32 %v692_v45, %v1758_v36  ;;  %v726_v19 = vpop.f32.mrf.mxu1 }
 0x257   : > { %863 = vst [vmem:[%s1764_s24 + $0x40] sm:$0xff] %v1056_v16  ;;  %v727_v21 = vadd.f32 %v726_v19, %v1758_v36  ;;  %v694_v24 = vpop.f32.mrf.mxu0 }
 0x258   : > { %v1050_v46 = vpack.c.bf16 %v693_v18, %v691_v17  ;;  %v730_v12 = vpop.f32.mrf.mxu1  ;;  %v695_v27 = vadd.f32 %v694_v24, %v1756_v59 }
 0x259   : > { %v1057_v55 = vpack.c.bf16 %v727_v21, %v725_v20  ;;  %v696_v26 = vpop.f32.mrf.mxu0  ;;  %v731_v32 = vadd.f32 %v730_v12, %v1756_v59 }
 0x25a   : > { %857 = vst [vmem:[%s1764_s24 + $0x10] sm:$0xff] %v1050_v46  ;;  %v697_v31 = vadd.f32 %v696_v26, %v1758_v36  ;;  %v732_v14 = vpop.f32.mrf.mxu1 }
 0x25b   : > { %864 = vst [vmem:[%s1764_s24 + $0x48] sm:$0xff] %v1057_v55  ;;  %v733_v22 = vadd.f32 %v732_v14, %v1758_v36  ;;  %v700_v15 = vpop.f32.mrf.mxu0 }
 0x25c   : > { %v1051_v33 = vpack.c.bf16 %v697_v31, %v695_v27  ;;  %v734_v56 = vpop.f32.mrf.mxu1  ;;  %v701_v35 = vadd.f32 %v700_v15, %v1756_v59 }
 0x25d   : > { %v1058_v34 = vpack.c.bf16 %v733_v22, %v731_v32  ;;  %v702_v0 = vpop.f32.mrf.mxu0  ;;  %v735_v41 = vadd.f32 %v734_v56, %v1756_v59 }
 0x25e   : > { %858 = vst [vmem:[%s1764_s24 + $0x18] sm:$0xff] %v1051_v33  ;;  %v703_v39 = vadd.f32 %v702_v0, %v1758_v36  ;;  %v736_v40 = vpop.f32.mrf.mxu1 }
 0x25f   : > { %865 = vst [vmem:[%s1764_s24 + $0x50] sm:$0xff] %v1058_v34  ;;  %v737_v42 = vadd.f32 %v736_v40, %v1758_v36  ;;  %v704_v1 = vpop.f32.mrf.mxu0 }
 0x260   : > { %v1052_v10 = vpack.c.bf16 %v703_v39, %v701_v35  ;;  %v740_v43 = vpop.f32.mrf.mxu1  ;;  %v705_v47 = vadd.f32 %v704_v1, %v1756_v59 }
 0x261   : > { %v1059_v29 = vpack.c.bf16 %v737_v42, %v735_v41  ;;  %v706_v44 = vpop.f32.mrf.mxu0  ;;  %v741_v49 = vadd.f32 %v740_v43, %v1756_v59 }
 0x262   : > { %859 = vst [vmem:[%s1764_s24 + $0x20] sm:$0xff] %v1052_v10  ;;  %v707_v23 = vadd.f32 %v706_v44, %v1758_v36  ;;  %v742_v48 = vpop.f32.mrf.mxu1 }
 0x263   : > { %866 = vst [vmem:[%s1764_s24 + $0x58] sm:$0xff] %v1059_v29  ;;  %v743_v11 = vadd.f32 %v742_v48, %v1758_v36  ;;  %v710_v50 = vpop.f32.mrf.mxu0 }
 0x264   : > { %v1053_v25 = vpack.c.bf16 %v707_v23, %v705_v47  ;;  %v744_v51 = vpop.f32.mrf.mxu1  ;;  %v711_v54 = vadd.f32 %v710_v50, %v1756_v59 }
 0x265   : > { %v1060_v52 = vpack.c.bf16 %v743_v11, %v741_v49  ;;  %v712_v53 = vpop.f32.mrf.mxu0  ;;  %v745_v58 = vadd.f32 %v744_v51, %v1756_v59 }
 0x266   : > { %860 = vst [vmem:[%s1764_s24 + $0x28] sm:$0xff] %v1053_v25  ;;  %v713_v57 = vadd.f32 %v712_v53, %v1758_v36  ;;  %v746_v13 = vpop.f32.mrf.mxu1 }
 0x267   : > { %867 = vst [vmem:[%s1764_s24 + $0x60] sm:$0xff] %v1060_v52  ;;  %v747_v9 = vadd.f32 %v746_v13, %v1758_v36  ;;  %v714_v30 = vpop.f32.mrf.mxu0 }
 0x268   : > { %v1054_v60 = vpack.c.bf16 %v713_v57, %v711_v54  ;;  %v750_v28 = vpop.f32.mrf.mxu1  ;;  %v715_v62 = vadd.f32 %v714_v30, %v1756_v59 }
 0x269   : > { %v1061_v61 = vpack.c.bf16 %v747_v9, %v745_v58  ;;  %v716_v37 = vpop.f32.mrf.mxu0  ;;  %v751_v3 = vadd.f32 %v750_v28, %v1756_v59 }
 0x26a   : > { %861 = vst [vmem:[%s1764_s24 + $0x30] sm:$0xff] %v1054_v60  ;;  %v717_v63 = vadd.f32 %v716_v37, %v1758_v36  ;;  %v752_v2 = vpop.f32.mrf.mxu1 }
 0x26b   : > { %868 = vst [vmem:[%s1764_s24 + $0x68] sm:$0xff] %v1061_v61  ;;  %v753_v4 = vadd.f32 %v752_v2, %v1758_v36 }
 0x26c   : > { %v1055_v5 = vpack.c.bf16 %v717_v63, %v715_v62  ;;  %v754_v6 = vpop.f32.mrf.mxu1 }
 0x26d   : > { %v1062_v38 = vpack.c.bf16 %v753_v4, %v751_v3  ;;  %v755_v8 = vadd.f32 %v754_v6, %v1756_v59 }
 0x26e   : > { %862 = vst [vmem:[%s1764_s24 + $0x38] sm:$0xff] %v1055_v5  ;;  %v756_v7 = vpop.f32.mrf.mxu1 }
 0x26f   : > { %869 = vst [vmem:[%s1764_s24 + $0x70] sm:$0xff] %v1062_v38  ;;  %v757_v16 = vadd.f32 %v756_v7, %v1758_v36 }
 0x271   : > { %v1063_v45 = vpack.c.bf16 %v757_v16, %v755_v8 }
 0x273   : > { %870 = vst [vmem:[%s1764_s24 + $0x78] sm:$0xff] %v1063_v45 }
 0x274   : > { %1318 = shalt.err (!%p1315_p2)
}
 0x275   : > { %s1319_s9 = scalar_lea.hbm %s1816_s11, 2048  ;;  %s1323_s23 = scalar_lea.hbm %s1872_s5, 4096 }
 0x276   : > { %p1320_p6 = scmp.ne.s32.totalorder %s1816_s11, %s1319_s9  ;;  %p1324_p0 = scmp.lt.s32.totalorder %s1816_s11, %s1872_s5 }
 0x277   : > { %p1325_p10 = scmp.lt.s32.totalorder %s1323_s23, %s1319_s9 }
 0x278   : > { %p1321_p11 = pnand %p1320_p6, %p1899_p7 }
 0x279   : > { %p1326_p5 = por %p1325_p10, %p1324_p0 }
 0x27a   : > { %p1322_p1 = pneg %p1321_p11 }
 0x27c   : > { %p1327_p3 = pnand %p1326_p5, %p1322_p1 }
 0x27e   : > { %1330 = shalt.err (!%p1327_p3)
}
 0x27f   : > { %s1398_s6 = smov 128   ;;  %s1399_s24 = smov 8  }
 0x280   : > { %1091 = dma.vmem_to_hbm [thread:$0]  (%p1899_p7), %s1818_s16, 2048, %s1816_s11, %s872_s21, %s1398_s6, %s1398_s6, %s1399_s24  }
 0x281 PF: > { %s1900_s25 = sld [smem:[#allocation13_spill]]  ;;  %s903_s27 = sand.u32 1, %s1369_s18  }
 0x282   : > { %s1901_s12 = sld [smem:[#allocation12_spill]]  ;;  %s904_s7 = scalar_lea.sflag [#allocation4], %s903_s27 }
 0x287   : > { %p1902_p8 = scmp.ne.s32.totalorder %s1900_s25, 0 }
 0x288   : > { %p1903_p9 = scmp.ge.s32.totalorder %s1901_s12, 2 }
 0x28a   : > { %p1105_p12 = pnand %p1903_p9, %p1902_p8 }
 0x28c   : > { %p1106_p13 = pneg %p1105_p12 }
 0x28e   : > { %1364 = dma.done.wait (%p1106_p13), %s904_s7, 2048  }
 0x28f   : > { %1366 = vsyncadd (%p1106_p13), %s904_s7, 4294965248  ;;  %s22_s23 = sadd.s32 1, %s1901_s12   ;;  %s1904_s18 = smov %s1373_s19 }
 0x290   : > { %p19_p4 = scmp.ge.s32.totalorder %s22_s23, 4   ;;  %s1905_s19 = smov %s1377_s20 }
 0x291   : > { %s1906_s20 = smov %s1557_s30  ;;  %s1907_s21 = smov %s1385_s22 }
 0x292   : > { %s1908_s22 = smov %s1910_s10  ;;  %21 = sbr.rel (!%p19_p4) target bundleno = 9 (0x9), region = 93 }
 0x297   :  { %909 = vsyncpa [#allocation3], 1 }
 0x298   :  { %911 = vsyncpa [#allocation3 + $0x1], 1 }
 0x299   :  { %912 = vsyncpa [#allocation6], 1 }
 0x29a   :  { %913 = vsyncpa [#allocation4], 1 }
 0x29b   :  { %915 = vsyncpa [#allocation4 + $0x1], 1 }

// kernel: tpu_custom_call.1
= control target key start
LH: loop header
LB: loop body
LE: loop exit
PB: predicated region body
PF: predicated region fallthrough
CT: control target
= control target key end

     0   :  { %s1867_s0 = inlined_call_operand.hbm [shape: f32[2,128,128], index: 0, kind: input, shape index: {}]   ;;  %s1868_s1 = inlined_call_operand.vmem [shape: f32[1,128], index: 1, kind: input, shape index: {}]   ;;  %s1869_s2 = inlined_call_operand.hbm [shape: f32[1,128], index: 2, kind: input, shape index: {}]   ;;  %s1870_s3 = inlined_call_operand.hbm [shape: bf16[128,256], index: 3, kind: input, shape index: {}]   ;;  %s1871_s4 = inlined_call_operand.vmem [shape: f32[1,256], index: 4, kind: input, shape index: {}]   ;;  %s1872_s5 = inlined_call_operand.hbm [shape: bf16[2,128,256], index: 5, kind: output, shape index: {}]  }
   0x1   :  { %1882 = sst [smem:[#allocation14_spill]] %s1869_s2 }
   0x2   :  { %10 = vsyncpa [#allocation3], 0 }
   0x3   :  { %12 = vsyncpa [#allocation3 + $0x1], 0 }
   0x4   :  { %13 = vsyncpa [#allocation6], 0 }
   0x5   :  { %14 = vsyncpa [#allocation4], 0 }
   0x6   :  { %16 = vsyncpa [#allocation4 + $0x1], 0  ;;  %s1430_s18 = smov 0   ;;  %s1432_s19 = smov 0  }
   0x7   :  { %s1434_s20 = smov 0   ;;  %s1436_s21 = smov 0  }
   0x8   :  { %s1438_s22 = smov 0   ;;  %s1440_s23 = smov 0  }
   0x9 LB: > { %1883 = sst [smem:[#allocation12_spill]] %s1389_s23  ;;  %s994_s24 = sadd.s32 4294967295, %s1389_s23   ;;  %s1389_s23 = sphi %s1440_s23, %s22_s23   ;;  %s1385_s22 = sphi %s1438_s22, %s1908_s22   ;;  %s1381_s21 = sphi %s1436_s21, %s1907_s21   ;;  %s1377_s20 = sphi %s1434_s20, %s1906_s20   ;;  %s1373_s19 = sphi %s1432_s19, %s1905_s19   ;;  %s1369_s18 = sphi %s1430_s18, %s1904_s18  }
   0xa   : > { %s995_s25 = sadd.s32 4294967294, %s1389_s23   ;;  %p50_p0 = scmp.ne.s32.totalorder %s1377_s20, %s1373_s19 }
   0xb   : > { %p51_p1 = scmp.eq.s32.totalorder %s1389_s23, 0  ;;  %p56_p2 = scmp.ne.s32.totalorder %s1373_s19, %s1369_s18 }
   0xc   : > { %p1467_p3 = scmp.eq.s32.totalorder %s994_s24, 0  ;;  %p166_p4 = scmp.eq.s32.totalorder %s994_s24, 1 }
   0xd   : > { %p1471_p5 = por %p51_p1, %p50_p0  ;;  %p172_p6 = scmp.eq.s32.totalorder %s995_s25, 1 }
   0xe   : > { %s1884_s26 = scalar_select %p1467_p3, 1, 0 }
   0xf   : > { %p1477_p7 = por %p1467_p3, %p56_p2  ;;  %p1481_p8 = por %p166_p4, %p50_p0 }
  0x10   : > { %p1485_p9 = por %p172_p6, %p56_p2  ;;  %p996_p10 = scmp.ge.s32.totalorder %s1389_s23, 1 }
  0x11   : > { %s1886_s28 = scalar_select %p1477_p7, 1, 0 }
  0x12   : > { %s1887_s29 = scalar_select %p1481_p8, 1, 0 }
  0x13   : > { %s1888_s30 = scalar_select %p1485_p9, 1, 0 }
  0x14   : > { %p179_p11 = scmp.lt.s32.totalorder %s1389_s23, 3  ;;  %s1391_s7 = smov [#allocation5]  }
  0x15   : > { %1889 = sst [smem:[#allocation13_spill]] %s1888_s30  ;;  %s195_s8 = sshll.u32 %s1391_s7, 4  ;;  %s196_s8 = int_to_ptr.vmem [resolvable:$true] %s195_s8 }
  0x16   : > { %p1492_p13 = pnand %p996_p10, %p179_p11  ;;  %p1110_p1 = scmp.lt.s32.totalorder %s1389_s23, 2 }
  0x17   : > { %s1392_s10 = smov [#allocation7]   ;;  %s1236_s13 = scalar_lea.vmem %s196_s8, 16 }
  0x18   : > { %s1890_s6 = scalar_select %p1492_p13, 1, 0 }
  0x19   : > { %p1093_p0 = pneg %p1492_p13  ;;  %p1501_p4 = pnand %p1110_p1, %p1471_p5 }
  0x1a   : > { %s205_s11 = sshll.u32 %s1392_s10, 4  ;;  %p1237_p10 = scmp.ne.s32.totalorder %s196_s8, %s1236_s13  ;;  %s206_s11 = int_to_ptr.vmem [resolvable:$true] %s205_s11 }
  0x1b   : > { %s1891_s9 = scalar_select %p1501_p4, 1, 0 }
  0x1c   : > { %p1507_p2 = pnand %p1093_p0, %p1467_p3  ;;  %s1243_s14 = scalar_lea.vmem %s196_s8, 32 }
  0x1d   : > { %p1244_p1 = scmp.lt.s32.totalorder %s196_s8, %s196_s8  ;;  %p1245_p12 = scmp.lt.s32.totalorder %s1243_s14, %s1236_s13 }
  0x1e   : > { %p1227_p6 = pneg %p1507_p2 }
  0x1f   : > { %p1246_p9 = por %p1245_p12, %p1244_p1 }
  0x20   : > { %p1239_p5 = pnand %p1237_p10, %p1227_p6 }
  0x22   : > { %p1240_p11 = pneg %p1239_p5 }
  0x24   : > { %p1247_p8 = pnand %p1246_p9, %p1240_p11 }
  0x26   : > { %1250 = shalt.err (!%p1247_p8)
}
  0x27   : > { %s1893_s2 = sld [smem:[#allocation14_spill]]  ;;  %s1262_s17 = scalar_lea.vmem %s206_s11, 2048 }
  0x28   : > { %p1263_p0 = scmp.ne.s32.totalorder %s206_s11, %s1262_s17  ;;  %p1270_p5 = scmp.lt.s32.totalorder %s206_s11, %s206_s11 }
  0x29   : > { %p1271_p7 = scmp.lt.s32.totalorder %s1262_s17, %s1262_s17 }
  0x2a   : > { %p1265_p3 = pnand %p1263_p0, %p1227_p6 }
  0x2b   : > { %p1272_p13 = por %p1271_p7, %p1270_p5 }
  0x2c   : > { %p1266_p10 = pneg %p1265_p3 }
  0x2d   : > { %1096 = dma.hbm_to_vmem [thread:$0]  (!%p1507_p2), %s1893_s2, 16, %s196_s8, [#allocation6]  }
  0x2e   : > { %p1273_p4 = pnand %p1272_p13, %p1266_p10 }
  0x30   : > { %1276 = shalt.err (!%p1273_p4)
}
  0x31   : > { %s1393_s24 = smov 128   ;;  %s1394_s25 = smov 8  }
  0x32   : > { %1099 = dma.hbm_to_vmem [thread:$0]  (!%p1507_p2), %s1870_s3, 2048, %s206_s11, [#allocation6], %s1393_s24, %s1393_s24, %s1394_s25  }
  0x33   : > { %s222_s8 = sand.u32 1, %s1377_s20   ;;  %s34_s10 = sadd.s32 1, %s1385_s22 }
  0x34   : > { %s1000_s13 = sshll.u32 %s222_s8, 7  ;;  %p36_p3 = scmp.ge.s32.totalorder %s34_s10, 2 }
  0x35   : > { %s1047_s14 = sshll.u32 %s1385_s22, 11  ;;  %s226_s15 = scalar_lea.vmem [#allocation2], %s1000_s13 }
  0x36   : > { %s235_s16 = sshll.u32 %s226_s15, 4  ;;  %s1910_s10 = smov (%p36_p3, %s34_s10), 0  ;;  %s236_s16 = int_to_ptr.vmem [resolvable:$true] %s235_s16 }
  0x37   : > { %s234_s12 = scalar_lea.hbm %s1867_s0, %s1047_s14  ;;  %s43_s23 = sadd.s32 1, %s1377_s20 }
  0x38   : > { %s38_s30 = ssub.s32 %s1385_s22, %s1910_s10  ;;  %s223_s11 = scalar_lea.sflag [#allocation3], %s222_s8 }
  0x39   : > { %p1543_p7 = scmp.eq.s32.totalorder %s38_s30, 0  ;;  %p1895_p8 = scmp.ne.s32.totalorder %s1891_s9, 0 }
  0x3a   : > { %s1290_s7 = scalar_lea.vmem %s236_s16, 2048  ;;  %s1395_s13 = smov [#allocation2]  }
  0x3b   : > { %p1279_p9 = pneg %p1895_p8  ;;  %p1291_p12 = scmp.ne.s32.totalorder %s236_s16, %s1290_s7 }
  0x3c   : > { %s1295_s15 = sshll.u32 %s1395_s13, 4  ;;  %s1296_s15 = int_to_ptr.vmem [resolvable:$false] %s1295_s15 }
  0x3d   : > { %p1293_p13 = pnand %p1291_p12, %p1279_p9  ;;  %s1297_s2 = scalar_lea.vmem %s1296_s15, 4096 }
  0x3e   : > { %p1298_p2 = scmp.lt.s32.totalorder %s236_s16, %s1296_s15  ;;  %p1299_p6 = scmp.lt.s32.totalorder %s1297_s2, %s1290_s7 }
  0x3f   : > { %p1294_p4 = pneg %p1293_p13 }
  0x40   : > { %p1300_p11 = por %p1299_p6, %p1298_p2 }
  0x42   : > { %p1301_p1 = pnand %p1300_p11, %p1294_p4 }
  0x44   : > { %1304 = shalt.err (!%p1301_p1)
}
  0x45   : > { %1103 = dma.hbm_to_vmem [thread:$0]  (!%p1895_p8), %s234_s12, 2048, %s236_s16, %s223_s11, %s1393_s24, %s1393_s24, %s1394_s25  }
  0x46   : > { %s1557_s30 = scalar_select %p1543_p7, %s1377_s20, %s43_s23  }
  0x47   : > { %p1896_p0 = scmp.ne.s32.totalorder %s1890_s6, 0 }
  0x48   : > { %s1562_s8 = sand.u32 (!%p1896_p0), 1, %s1373_s19   ;;  %p1897_p10 = scmp.ne.s32.totalorder (!%p1896_p0), %s1886_s28, 0 }
  0x49   : > { %247 = sbr.rel (%p1896_p0) target bundleno = 641 (0x281), region = 40  ;;  %s1004_s9 = sshll.u32 (!%p1896_p0), %s1562_s8, 7 }
  0x4a   : > { %s250_s14 = scalar_lea.sflag (!%p1896_p0), [#allocation3], %s1562_s8  ;;  %s1568_s17 = scalar_lea.vmem (!%p1896_p0), [#allocation2], %s1004_s9 }
  0x4e   : > { %1356 = dma.done.wait (%p1897_p10), %s250_s14, 2048  }
  0x4f   : > { %1358 = vsyncadd (%p1897_p10), %s250_s14, 4294965248  ;;  %p1898_p5 = scmp.ne.s32.totalorder %s1884_s26, 0 }
  0x51   : > { %1360 = dma.done.wait (%p1898_p5), [#allocation6], 2064  }
  0x52   : > { %1362 = vsyncadd (%p1898_p5), [#allocation6], 4294965232  ;;  %v291_v0 = vld [vmem:[%s1568_s17] sm:$0xff]  ;;  %v292_v2 = vld [vmem:[%s1568_s17 + $0x8] sm:$0xff]  ;;  %s1764_s24 = scalar_lea.vmem [#allocation8], %s1004_s9  ;;  %s1064_s25 = sshll.u32 %s1381_s21, 11 }
  0x53   : > { %v299_v1 = vld [vmem:[%s1568_s17 + $0x40] sm:$0xff]  ;;  %309 = vadd.xlane.f32.xlu0 %v291_v0  ;;  %v300_v3 = vld [vmem:[%s1568_s17 + $0x48] sm:$0xff]  ;;  %v293_v4 = vld [vmem:[%s1568_s17 + $0x10] sm:$0xff]  ;;  %s888_s16 = sshll.u32 %s1764_s24, 4  ;;  %s1816_s11 = scalar_lea.hbm %s1872_s5, %s1064_s25  ;;  %s1818_s16 = int_to_ptr.vmem [resolvable:$true] %s888_s16 }
  0x54   : > { %325 = vadd.xlane.f32.xlu1 %v299_v1  ;;  %v294_v5 = vld [vmem:[%s1568_s17 + $0x18] sm:$0xff]  ;;  %v301_v6 = vld [vmem:[%s1568_s17 + $0x50] sm:$0xff]  ;;  %v1587_v8 = vld [vmem:[%s1568_s17 + $0x20] sm:$0xff]  ;;  %s872_s21 = scalar_lea.sflag [#allocation4], %s1562_s8  ;;  %s1305_s7 = scalar_lea.vmem %s1818_s16, 2048 }
  0x55   : > { %v302_v7 = vld [vmem:[%s1568_s17 + $0x58] sm:$0xff]  ;;  %v1590_v9 = vld [vmem:[%s1568_s17 + $0x28] sm:$0xff]  ;;  %v1595_v10 = vld [vmem:[%s1568_s17 + $0x60] sm:$0xff]  ;;  %p1306_p3 = scmp.ne.s32.totalorder %s1818_s16, %s1305_s7  ;;  %p1899_p7 = scmp.ne.s32.totalorder %s1887_s29, 0 }
  0x56   : > { %v1598_v11 = vld [vmem:[%s1568_s17 + $0x68] sm:$0xff]  ;;  %v1603_v12 = vld [vmem:[%s1568_s17 + $0x30] sm:$0xff]  ;;  %v1606_v13 = vld [vmem:[%s1568_s17 + $0x38] sm:$0xff]  ;;  %s1397_s13 = smov [#allocation8]  }
  0x57   : > { %311 = vadd.xlane.f32.xlu0 %v292_v2  ;;  %v1611_v14 = vld [vmem:[%s1568_s17 + $0x70] sm:$0xff]  ;;  %v1614_v15 = vld [vmem:[%s1568_s17 + $0x78] sm:$0xff]  ;;  %v1174_v54 = vld [vmem:[#allocation7 + $0x60] ss:$8 sps:$4 sm:$0xff]   ;;  %p1307_p8 = pnand %p1306_p3, %p1899_p7  ;;  %s1309_s15 = sshll.u32 %s1397_s13, 4  ;;  %s1310_s15 = int_to_ptr.vmem [resolvable:$false] %s1309_s15 }
  0x58   : > { %327 = vadd.xlane.f32.xlu1 %v300_v3  ;;  %v1169_v16 = vld [vmem:[#allocation7 + $0x74] ss:$8 sps:$4 sm:$0xff]   ;;  %v1171_v17 = vld [vmem:[#allocation7 + $0x70] ss:$8 sps:$4 sm:$0xff]   ;;  %v1172_v53 = vld [vmem:[#allocation7 + $0x64] ss:$8 sps:$4 sm:$0xff]   ;;  %p1312_p12 = scmp.lt.s32.totalorder %s1818_s16, %s1310_s15 }
  0x59   : > { %646 = vmatprep.subr.bf16.mxu0 %v1169_v16  ;;  %1065 = vmatprep.subr.bf16.mxu1 %v1169_v16  ;;  %v1175_v63 = vld [vmem:[#allocation7 + $0x54] ss:$8 sps:$4 sm:$0xff]   ;;  %p1308_p9 = pneg %p1307_p8  ;;  %s1311_s2 = scalar_lea.vmem %s1310_s15, 4096 }
  0x5a   : > { %647 = vmatpush1.bf16.msra.mxu0 %v1171_v17  ;;  %1073 = vmatpush1.bf16.msra.mxu1 %v1171_v17  ;;  %v1180_v17 = vld [vmem:[#allocation7 + $0x40] ss:$8 sps:$4 sm:$0xff]   ;;  %p1313_p13 = scmp.lt.s32.totalorder %s1311_s2, %s1305_s7 }
  0x5b   : > { %313 = vadd.xlane.f32.xlu0 %v293_v4  ;;  %648 = vmatprep.subr.bf16.mxu0 %v1172_v53 }
  0x5c   : > { %315 = vadd.xlane.f32.xlu1 %v294_v5  ;;  %1066 = vmatprep.subr.bf16.mxu1 %v1172_v53  ;;  %p1314_p4 = por %p1313_p13, %p1312_p12 }
  0x5e   : > { %649 = vmatpush1.bf16.msra.mxu0 %v1174_v54  ;;  %1074 = vmatpush1.bf16.msra.mxu1 %v1174_v54  ;;  %p1315_p2 = pnand %p1314_p4, %p1308_p9 }
  0x5f   : > { %329 = vadd.xlane.f32.xlu0 %v301_v6  ;;  %650 = vmatprep.subr.bf16.mxu0 %v1175_v63 }
  0x60   : > { %331 = vadd.xlane.f32.xlu1 %v302_v7  ;;  %1067 = vmatprep.subr.bf16.mxu1 %v1175_v63 }
  0x63   : > { %317 = vadd.xlane.f32.xlu0 %v1587_v8 }
  0x64   : > { %319 = vadd.xlane.f32.xlu1 %v1590_v9 }
  0x67   : > { %333 = vadd.xlane.f32.xlu0 %v1595_v10 }
  0x68   : > { %335 = vadd.xlane.f32.xlu1 %v1598_v11 }
  0x6b   : > { %321 = vadd.xlane.f32.xlu0 %v1603_v12 }
  0x6c   : > { %323 = vadd.xlane.f32.xlu1 %v1606_v13 }
  0x6f   : > { %337 = vadd.xlane.f32.xlu0 %v1611_v14 }
  0x70   : > { %339 = vadd.xlane.f32.xlu1 %v1614_v15 }
  0xdc   : > { %v310_v18 = vpop.xlane.xlu0 %309 }
  0xdd   : > { %v326_v19 = vpop.xlane.xlu1 %325  ;;  %v342_v20 = vmul.f32 0.0078125, %v310_v18 }
  0xde   : > { %v350_v21 = vmul.f32 0.0078125, %v326_v19 }
  0xdf   : > { %v1618_v22 = vsub.f32 %v291_v0, %v342_v20 }
  0xe0   : > { %v1620_v23 = vsub.f32 %v299_v1, %v350_v21  ;;  %v312_v24 = vpop.xlane.xlu0 %311 }
  0xe1   : > { %v328_v25 = vpop.xlane.xlu1 %327  ;;  %v343_v26 = vmul.f32 0.0078125, %v312_v24  ;;  %v374_v27 = vmul.f32 %v1618_v22, %v1618_v22 }
  0xe2   : > { %v351_v28 = vmul.f32 0.0078125, %v328_v25  ;;  %v382_v31 = vmul.f32 %v1620_v23, %v1620_v23 }
  0xe3   : > { %v1624_v29 = vsub.f32 %v292_v2, %v343_v26  ;;  %390 = vadd.xlane.f32.xlu0 %v374_v27  ;;  %v1183_v27 = vld [vmem:[#allocation7 + $0x30] ss:$8 sps:$4 sm:$0xff]  }
  0xe4   : > { %v1626_v30 = vsub.f32 %v300_v3, %v351_v28  ;;  %v314_v32 = vpop.xlane.xlu0 %313  ;;  %v1177_v3 = vld [vmem:[#allocation7 + $0x50] ss:$8 sps:$4 sm:$0xff]  }
  0xe5   : > { %v316_v33 = vpop.xlane.xlu1 %315  ;;  %v344_v34 = vmul.f32 0.0078125, %v314_v32  ;;  %v375_v35 = vmul.f32 %v1624_v29, %v1624_v29  ;;  %651 = vmatpush1.bf16.msra.mxu0 %v1177_v3  ;;  %1075 = vmatpush1.bf16.msra.mxu1 %v1177_v3  ;;  %v1186_v32 = vld [vmem:[#allocation7 + $0x20] ss:$8 sps:$4 sm:$0xff]  }
  0xe6   : > { %v345_v36 = vmul.f32 0.0078125, %v316_v33  ;;  %v383_v39 = vmul.f32 %v1626_v30, %v1626_v30  ;;  %v1189_v33 = vld [vmem:[#allocation7 + $0x10] ss:$8 sps:$4 sm:$0xff]  }
  0xe7   : > { %v1632_v37 = vsub.f32 %v293_v4, %v344_v34  ;;  %406 = vadd.xlane.f32.xlu0 %v382_v31  ;;  %392 = vadd.xlane.f32.xlu1 %v375_v35  ;;  %v1184_v31 = vld [vmem:[#allocation7 + $0x24] ss:$8 sps:$4 sm:$0xff]   ;;  %v1192_v35 = vld [vmem:[#allocation7] ss:$8 sps:$4 sm:$0xff]  }
  0xe8   : > { %v1634_v38 = vsub.f32 %v294_v5, %v345_v36  ;;  %v330_v40 = vpop.xlane.xlu0 %329  ;;  %v1190_v34 = vld [vmem:[#allocation7 + $0x4] ss:$8 sps:$4 sm:$0xff]   ;;  %v1396_v36 = vmov 0  }
  0xe9   : > { %v332_v41 = vpop.xlane.xlu1 %331  ;;  %v352_v42 = vmul.f32 0.0078125, %v330_v40  ;;  %v376_v43 = vmul.f32 %v1632_v37, %v1632_v37  ;;  %678 = vmatprep.mubr.bf16.mxu0 %v1396_v36  ;;  %718 = vmatprep.mubr.bf16.mxu1 %v1396_v36 }
  0xea   : > { %v353_v44 = vmul.f32 0.0078125, %v332_v41  ;;  %v377_v47 = vmul.f32 %v1634_v38, %v1634_v38 }
  0xeb   : > { %v1640_v45 = vsub.f32 %v301_v6, %v352_v42  ;;  %408 = vadd.xlane.f32.xlu1 %v383_v39  ;;  %394 = vadd.xlane.f32.xlu0 %v376_v43 }
  0xec   : > { %v1642_v46 = vsub.f32 %v302_v7, %v353_v44  ;;  %v318_v48 = vpop.xlane.xlu0 %317 }
  0xed   : > { %v320_v49 = vpop.xlane.xlu1 %319  ;;  %v346_v50 = vmul.f32 0.0078125, %v318_v48  ;;  %v384_v51 = vmul.f32 %v1640_v45, %v1640_v45 }
  0xee   : > { %v347_v52 = vmul.f32 0.0078125, %v320_v49  ;;  %v385_v57 = vmul.f32 %v1642_v46, %v1642_v46 }
  0xef   : > { %v1649_v55 = vsub.f32 %v1587_v8, %v346_v50  ;;  %396 = vadd.xlane.f32.xlu1 %v377_v47  ;;  %410 = vadd.xlane.f32.xlu0 %v384_v51 }
  0xf0   : > { %v1652_v56 = vsub.f32 %v1590_v9, %v347_v52  ;;  %v334_v58 = vpop.xlane.xlu0 %333  ;;  %v1178_v9 = vld [vmem:[#allocation7 + $0x44] ss:$8 sps:$4 sm:$0xff]  }
  0xf1   : > { %v336_v59 = vpop.xlane.xlu1 %335  ;;  %v354_v60 = vmul.f32 0.0078125, %v334_v58  ;;  %v378_v61 = vmul.f32 %v1649_v55, %v1649_v55  ;;  %652 = vmatprep.subr.bf16.mxu0 %v1178_v9  ;;  %1068 = vmatprep.subr.bf16.mxu1 %v1178_v9  ;;  %v1695_v9 = vld [vmem:[%s1868_s1] ss:$0 sm:$0xff] }
  0xf2   : > { %v355_v62 = vmul.f32 0.0078125, %v336_v59  ;;  %v379_v2 = vmul.f32 %v1652_v56, %v1652_v56  ;;  %653 = vmatpush1.bf16.msra.mxu0 %v1180_v17  ;;  %1076 = vmatpush1.bf16.msra.mxu1 %v1180_v17 }
  0xf3   : > { %v1659_v0 = vsub.f32 %v1595_v10, %v354_v60  ;;  %412 = vadd.xlane.f32.xlu1 %v385_v57  ;;  %398 = vadd.xlane.f32.xlu0 %v378_v61 }
  0xf4   : > { %v1662_v1 = vsub.f32 %v1598_v11, %v355_v62  ;;  %v322_v4 = vpop.xlane.xlu0 %321 }
  0xf5   : > { %v324_v5 = vpop.xlane.xlu1 %323  ;;  %v348_v6 = vmul.f32 0.0078125, %v322_v4  ;;  %v386_v7 = vmul.f32 %v1659_v0, %v1659_v0 }
  0xf6   : > { %v349_v8 = vmul.f32 0.0078125, %v324_v5  ;;  %v387_v16 = vmul.f32 %v1662_v1, %v1662_v1 }
  0xf7   : > { %v1669_v10 = vsub.f32 %v1603_v12, %v348_v6  ;;  %400 = vadd.xlane.f32.xlu1 %v379_v2  ;;  %414 = vadd.xlane.f32.xlu0 %v386_v7  ;;  %v1181_v12 = vld [vmem:[#allocation7 + $0x34] ss:$8 sps:$4 sm:$0xff]  }
  0xf8   : > { %v1672_v11 = vsub.f32 %v1606_v13, %v349_v8  ;;  %v338_v18 = vpop.xlane.xlu0 %337  ;;  %654 = vmatprep.subr.bf16.mxu0 %v1181_v12  ;;  %1069 = vmatprep.subr.bf16.mxu1 %v1181_v12 }
  0xf9   : > { %v340_v19 = vpop.xlane.xlu1 %339  ;;  %v356_v20 = vmul.f32 0.0078125, %v338_v18  ;;  %v380_v21 = vmul.f32 %v1669_v10, %v1669_v10  ;;  %655 = vmatpush1.bf16.msra.mxu0 %v1183_v27  ;;  %1077 = vmatpush1.bf16.msra.mxu1 %v1183_v27 }
  0xfa   : > { %v357_v24 = vmul.f32 0.0078125, %v340_v19  ;;  %v381_v26 = vmul.f32 %v1672_v11, %v1672_v11  ;;  %656 = vmatprep.subr.bf16.mxu0 %v1184_v31  ;;  %1070 = vmatprep.subr.bf16.mxu1 %v1184_v31 }
  0xfb   : > { %v1679_v25 = vsub.f32 %v1611_v14, %v356_v20  ;;  %416 = vadd.xlane.f32.xlu1 %v387_v16  ;;  %402 = vadd.xlane.f32.xlu0 %v380_v21 }
  0xfc   : > { %v1682_v13 = vsub.f32 %v1614_v15, %v357_v24  ;;  %v1187_v15 = vld [vmem:[#allocation7 + $0x14] ss:$8 sps:$4 sm:$0xff]  }
  0xfd   : > { %v388_v28 = vmul.f32 %v1679_v25, %v1679_v25  ;;  %657 = vmatpush1.bf16.msra.mxu0 %v1186_v32  ;;  %1078 = vmatpush1.bf16.msra.mxu1 %v1186_v32 }
  0xfe   : > { %v389_v14 = vmul.f32 %v1682_v13, %v1682_v13  ;;  %658 = vmatprep.subr.bf16.mxu0 %v1187_v15  ;;  %1071 = vmatprep.subr.bf16.mxu1 %v1187_v15 }
  0xff   : > { %404 = vadd.xlane.f32.xlu1 %v381_v26  ;;  %418 = vadd.xlane.f32.xlu0 %v388_v28  ;;  %v1699_v28 = vld [vmem:[#allocation5] ss:$0 sm:$0xff] }
 0x101   : > { %659 = vmatpush1.bf16.msra.mxu0 %v1189_v33  ;;  %1079 = vmatpush1.bf16.msra.mxu1 %v1189_v33 }
 0x102   : > { %660 = vmatprep.subr.bf16.mxu0 %v1190_v34  ;;  %1072 = vmatprep.subr.bf16.mxu1 %v1190_v34 }
 0x103   : > { %420 = vadd.xlane.f32.xlu1 %v389_v14 }
 0x105   : > { %661 = vmatpush1.bf16.msra.mxu0 %v1192_v35  ;;  %1080 = vmatpush1.bf16.msra.mxu1 %v1192_v35 }
 0x16c   : > { %v391_v39 = vpop.xlane.xlu0 %390 }
 0x16d   : > { %v422_v40 = vmul.f32 0.0078125, %v391_v39 }
 0x16f   : > { %v438_v41 = vadd.f32 1e-06, %v422_v40 }
 0x170   : > { %v393_v42 = vpop.xlane.xlu1 %392  ;;  %v407_v43 = vpop.xlane.xlu0 %406 }
 0x171   : > { %1193 = vrsqrt.f32 %v438_v41  ;;  %v423_v44 = vmul.f32 0.0078125, %v393_v42  ;;  %v430_v47 = vmul.f32 0.0078125, %v407_v43 }
 0x173   : > { %v439_v48 = vadd.f32 1e-06, %v423_v44  ;;  %v446_v49 = vadd.f32 1e-06, %v430_v47 }
 0x174   : > { %v409_v50 = vpop.xlane.xlu1 %408  ;;  %v395_v51 = vpop.xlane.xlu0 %394 }
 0x175   : > { %1195 = vrsqrt.f32 %v439_v48  ;;  %v431_v52 = vmul.f32 0.0078125, %v409_v50  ;;  %v424_v53 = vmul.f32 0.0078125, %v395_v51 }
 0x176   : > { %1197 = vrsqrt.f32 %v446_v49 }
 0x177   : > { %v447_v54 = vadd.f32 1e-06, %v431_v52  ;;  %v440_v57 = vadd.f32 1e-06, %v424_v53 }
 0x178   : > { %v397_v58 = vpop.xlane.xlu1 %396  ;;  %v411_v59 = vpop.xlane.xlu0 %410 }
 0x179   : > { %1199 = vrsqrt.f32 %v447_v54  ;;  %v425_v60 = vmul.f32 0.0078125, %v397_v58  ;;  %v432_v61 = vmul.f32 0.0078125, %v411_v59 }
 0x17a   : > { %1201 = vrsqrt.f32 %v440_v57 }
 0x17b   : > { %v441_v62 = vadd.f32 1e-06, %v425_v60  ;;  %v448_v63 = vadd.f32 1e-06, %v432_v61 }
 0x17c   : > { %v413_v2 = vpop.xlane.xlu1 %412  ;;  %v399_v3 = vpop.xlane.xlu0 %398 }
 0x17d   : > { %1203 = vrsqrt.f32 %v441_v62  ;;  %v433_v4 = vmul.f32 0.0078125, %v413_v2  ;;  %v426_v5 = vmul.f32 0.0078125, %v399_v3 }
 0x17e   : > { %v1194_v6 = vpop.eup %1193  ;;  %1205 = vrsqrt.f32 %v448_v63 }
 0x17f   : > { %v449_v7 = vadd.f32 1e-06, %v433_v4  ;;  %v442_v8 = vadd.f32 1e-06, %v426_v5  ;;  %v470_v16 = vmul.f32 %v1194_v6, %v1618_v22 }
 0x180   : > { %v401_v17 = vpop.xlane.xlu1 %400  ;;  %v415_v18 = vpop.xlane.xlu0 %414 }
 0x181   : > { %1207 = vrsqrt.f32 %v449_v7  ;;  %v427_v19 = vmul.f32 0.0078125, %v401_v17  ;;  %v434_v20 = vmul.f32 0.0078125, %v415_v18  ;;  %v492_v24 = vmul.f32 %v1695_v9, %v470_v16 }
 0x182   : > { %v1196_v21 = vpop.eup %1195  ;;  %1209 = vrsqrt.f32 %v442_v8 }
 0x183   : > { %v1198_v12 = vpop.eup %1197  ;;  %v443_v26 = vadd.f32 1e-06, %v427_v19  ;;  %v450_v27 = vadd.f32 1e-06, %v434_v20  ;;  %v471_v31 = vmul.f32 %v1196_v21, %v1624_v29  ;;  %v514_v39 = vadd.f32 %v1699_v28, %v492_v24 }
 0x184   : > { %v417_v14 = vpop.xlane.xlu1 %416  ;;  %v403_v32 = vpop.xlane.xlu0 %402  ;;  %v478_v22 = vmul.f32 %v1198_v12, %v1620_v23 }
 0x185   : > { %1211 = vrsqrt.f32 %v443_v26  ;;  %v435_v15 = vmul.f32 0.0078125, %v417_v14  ;;  %v428_v33 = vmul.f32 0.0078125, %v403_v32  ;;  %v493_v34 = vmul.f32 %v1695_v9, %v471_v31 }
 0x186   : > { %v1200_v35 = vpop.eup %1199  ;;  %1213 = vrsqrt.f32 %v450_v27  ;;  %v500_v23 = vmul.f32 %v1695_v9, %v478_v22 }
 0x187   : > { %v1202_v40 = vpop.eup %1201  ;;  %v451_v41 = vadd.f32 1e-06, %v435_v15  ;;  %v444_v42 = vadd.f32 1e-06, %v428_v33  ;;  %v515_v43 = vadd.f32 %v1699_v28, %v493_v34  ;;  %v479_v29 = vmul.f32 %v1200_v35, %v1626_v30 }
 0x188   : > { %v405_v44 = vpop.xlane.xlu1 %404  ;;  %v419_v47 = vpop.xlane.xlu0 %418  ;;  %v472_v48 = vmul.f32 %v1202_v40, %v1632_v37  ;;  %v522_v61 = vadd.f32 %v1699_v28, %v500_v23 }
 0x189   : > { %1215 = vrsqrt.f32 %v451_v41  ;;  %v429_v49 = vmul.f32 0.0078125, %v405_v44  ;;  %v436_v50 = vmul.f32 0.0078125, %v419_v47  ;;  %v530_v51 = vpack.c.bf16 %v515_v43, %v514_v39 }
 0x18a   : > { %v1204_v52 = vpop.eup %1203  ;;  %1217 = vrsqrt.f32 %v444_v42  ;;  %v501_v53 = vmul.f32 %v1695_v9, %v479_v29  ;;  %v494_v54 = vmul.f32 %v1695_v9, %v472_v48 }
 0x18b   : > { %v1206_v57 = vpop.eup %1205  ;;  %v445_v58 = vadd.f32 1e-06, %v429_v49  ;;  %v452_v59 = vadd.f32 1e-06, %v436_v50  ;;  %679 = vmatmul.mubr.bf16.vlgmr.msra.gmra.mxu0 %v530_v51  ;;  %v473_v30 = vmul.f32 %v1204_v52, %v1634_v38 }
 0x18c   : > { %v421_v60 = vpop.xlane.xlu1 %420  ;;  %v523_v37 = vadd.f32 %v1699_v28, %v501_v53  ;;  %688 = vmatprep.mubr.bf16.mxu0 %v1396_v36  ;;  %v480_v62 = vmul.f32 %v1206_v57, %v1640_v45  ;;  %v516_v5 = vadd.f32 %v1699_v28, %v494_v54  ;;  %v556_v53 = vlaneseq }
 0x18d   : > { %1219 = vrsqrt.f32 %v445_v58  ;;  %v437_v63 = vmul.f32 0.0078125, %v421_v60  ;;  %v495_v2 = vmul.f32 %v1695_v9, %v473_v30  ;;  %v554_v58 = vld [vmem:[%s1871_s4] sm:$0x3] }
 0x18e   : > { %v1208_v3 = vpop.eup %1207  ;;  %1221 = vrsqrt.f32 %v452_v59  ;;  %v534_v4 = vpack.c.bf16 %v523_v37, %v522_v61  ;;  %v502_v16 = vmul.f32 %v1695_v9, %v480_v62  ;;  %v557_v54 = vshrl.u32 %v556_v53, 7 }
 0x18f   : > { %v1210_v6 = vpop.eup %1209  ;;  %v453_v38 = vadd.f32 1e-06, %v437_v63  ;;  %v517_v7 = vadd.f32 %v1699_v28, %v495_v2  ;;  %v481_v8 = vmul.f32 %v1208_v3, %v1642_v46 }
 0x190   : > { %719 = vmatmul.mubr.bf16.vlgmr.msra.gmra.mxu1 %v534_v4  ;;  %v474_v45 = vmul.f32 %v1210_v6, %v1649_v55  ;;  %v524_v21 = vadd.f32 %v1699_v28, %v502_v16  ;;  %v558_v57 = vsub.s32 0, %v557_v54 }
 0x191   : > { %1223 = vrsqrt.f32 %v453_v38  ;;  %v531_v17 = vpack.c.bf16 %v517_v7, %v516_v5  ;;  %728 = vmatprep.mubr.bf16.mxu1 %v1396_v36  ;;  %v503_v18 = vmul.f32 %v1695_v9, %v481_v8 }
 0x192   : > { %v1212_v19 = vpop.eup %1211  ;;  %v496_v12 = vmul.f32 %v1695_v9, %v474_v45  ;;  %v1756_v59 = vrot.slane %v554_v58, %v558_v57 }
 0x193   : > { %v1214_v20 = vpop.eup %1213  ;;  %689 = vmatmul.mubr.bf16.gmra.mxu0 %v531_v17  ;;  %v525_v24 = vadd.f32 %v1699_v28, %v503_v18  ;;  %v475_v46 = vmul.f32 %v1212_v19, %v1652_v56 }
 0x194   : > { %698 = vmatprep.mubr.bf16.mxu0 %v1396_v36  ;;  %v482_v55 = vmul.f32 %v1214_v20, %v1659_v0  ;;  %v518_v32 = vadd.f32 %v1699_v28, %v496_v12 }
 0x195   : > { %v535_v26 = vpack.c.bf16 %v525_v24, %v524_v21  ;;  %v497_v27 = vmul.f32 %v1695_v9, %v475_v46 }
 0x196   : > { %v1216_v31 = vpop.eup %1215  ;;  %v504_v33 = vmul.f32 %v1695_v9, %v482_v55 }
 0x197   : > { %v1218_v14 = vpop.eup %1217  ;;  %v519_v22 = vadd.f32 %v1699_v28, %v497_v27  ;;  %v483_v15 = vmul.f32 %v1216_v31, %v1662_v1 }
 0x198   : > { %729 = vmatmul.mubr.bf16.gmra.mxu1 %v535_v26  ;;  %v476_v56 = vmul.f32 %v1218_v14, %v1669_v10  ;;  %v526_v40 = vadd.f32 %v1699_v28, %v504_v33 }
 0x199   : > { %v532_v34 = vpack.c.bf16 %v519_v22, %v518_v32  ;;  %738 = vmatprep.mubr.bf16.mxu1 %v1396_v36  ;;  %v505_v0 = vmul.f32 %v1695_v9, %v483_v15 }
 0x19a   : > { %v1220_v35 = vpop.eup %1219  ;;  %v498_v1 = vmul.f32 %v1695_v9, %v476_v56 }
 0x19b   : > { %v1222_v39 = vpop.eup %1221  ;;  %699 = vmatmul.mubr.bf16.gmra.mxu0 %v532_v34  ;;  %v527_v41 = vadd.f32 %v1699_v28, %v505_v0  ;;  %v477_v42 = vmul.f32 %v1220_v35, %v1672_v11 }
 0x19c   : > { %708 = vmatprep.mubr.bf16.mxu0 %v1396_v36  ;;  %v484_v10 = vmul.f32 %v1222_v39, %v1679_v25  ;;  %v520_v47 = vadd.f32 %v1699_v28, %v498_v1 }
 0x19d   : > { %v536_v43 = vpack.c.bf16 %v527_v41, %v526_v40  ;;  %v499_v29 = vmul.f32 %v1695_v9, %v477_v42 }
 0x19e   : > { %v1224_v44 = vpop.eup %1223  ;;  %v506_v49 = vmul.f32 %v1695_v9, %v484_v10 }
 0x19f   : > { %v521_v23 = vadd.f32 %v1699_v28, %v499_v29  ;;  %v485_v48 = vmul.f32 %v1224_v44, %v1682_v13  ;;  %v562_v13 = vsub.s32 1, %v557_v54 }
 0x1a0   : > { %739 = vmatmul.mubr.bf16.gmra.mxu1 %v536_v43  ;;  %v528_v25 = vadd.f32 %v1699_v28, %v506_v49 }
 0x1a1   : > { %v533_v11 = vpack.c.bf16 %v521_v23, %v520_v47  ;;  %748 = vmatprep.mubr.bf16.mxu1 %v1396_v36  ;;  %v507_v50 = vmul.f32 %v1695_v9, %v485_v48  ;;  %v1758_v36 = vrot.slane %v554_v58, %v562_v13 }
 0x1a3   : > { %709 = vmatmul.mubr.bf16.gmra.mxu0 %v533_v11  ;;  %v529_v51 = vadd.f32 %v1699_v28, %v507_v50 }
 0x1a5   : > { %v537_v52 = vpack.c.bf16 %v529_v51, %v528_v25 }
 0x1a8   : > { %749 = vmatmul.mubr.bf16.gmra.mxu1 %v537_v52 }
 0x24b   : > { %v680_v9 = vpop.f32.mrf.mxu0 }
 0x24c   : > { %v681_v60 = vadd.f32 %v680_v9, %v1756_v59 }
 0x24d   : > { %v682_v30 = vpop.f32.mrf.mxu0 }
 0x24e   : > { %v683_v28 = vadd.f32 %v682_v30, %v1758_v36 }
 0x24f   : > { %v684_v61 = vpop.f32.mrf.mxu0 }
 0x250   : > { %v1048_v37 = vpack.c.bf16 %v683_v28, %v681_v60  ;;  %v720_v62 = vpop.f32.mrf.mxu1  ;;  %v685_v2 = vadd.f32 %v684_v61, %v1756_v59 }
 0x251   : > { %v686_v63 = vpop.f32.mrf.mxu0  ;;  %v721_v5 = vadd.f32 %v720_v62, %v1756_v59 }
 0x252   : > { %855 = vst [vmem:[%s1764_s24] sm:$0xff] %v1048_v37  ;;  %v687_v3 = vadd.f32 %v686_v63, %v1758_v36  ;;  %v722_v4 = vpop.f32.mrf.mxu1 }
 0x253   : > { %v723_v6 = vadd.f32 %v722_v4, %v1758_v36  ;;  %v690_v38 = vpop.f32.mrf.mxu0 }
 0x254   : > { %v1049_v7 = vpack.c.bf16 %v687_v3, %v685_v2  ;;  %v724_v8 = vpop.f32.mrf.mxu1  ;;  %v691_v17 = vadd.f32 %v690_v38, %v1756_v59 }
 0x255   : > { %v1056_v16 = vpack.c.bf16 %v723_v6, %v721_v5  ;;  %v692_v45 = vpop.f32.mrf.mxu0  ;;  %v725_v20 = vadd.f32 %v724_v8, %v1756_v59 }
 0x256   : > { %856 = vst [vmem:[%s1764_s24 + $0x8] sm:$0xff] %v1049_v7  ;;  %v693_v18 = vadd.f32 %v692_v45, %v1758_v36  ;;  %v726_v19 = vpop.f32.mrf.mxu1 }
 0x257   : > { %863 = vst [vmem:[%s1764_s24 + $0x40] sm:$0xff] %v1056_v16  ;;  %v727_v21 = vadd.f32 %v726_v19, %v1758_v36  ;;  %v694_v24 = vpop.f32.mrf.mxu0 }
 0x258   : > { %v1050_v46 = vpack.c.bf16 %v693_v18, %v691_v17  ;;  %v730_v12 = vpop.f32.mrf.mxu1  ;;  %v695_v27 = vadd.f32 %v694_v24, %v1756_v59 }
 0x259   : > { %v1057_v55 = vpack.c.bf16 %v727_v21, %v725_v20  ;;  %v696_v26 = vpop.f32.mrf.mxu0  ;;  %v731_v32 = vadd.f32 %v730_v12, %v1756_v59 }
 0x25a   : > { %857 = vst [vmem:[%s1764_s24 + $0x10] sm:$0xff] %v1050_v46  ;;  %v697_v31 = vadd.f32 %v696_v26, %v1758_v36  ;;  %v732_v14 = vpop.f32.mrf.mxu1 }
 0x25b   : > { %864 = vst [vmem:[%s1764_s24 + $0x48] sm:$0xff] %v1057_v55  ;;  %v733_v22 = vadd.f32 %v732_v14, %v1758_v36  ;;  %v700_v15 = vpop.f32.mrf.mxu0 }
 0x25c   : > { %v1051_v33 = vpack.c.bf16 %v697_v31, %v695_v27  ;;  %v734_v56 = vpop.f32.mrf.mxu1  ;;  %v701_v35 = vadd.f32 %v700_v15, %v1756_v59 }
 0x25d   : > { %v1058_v34 = vpack.c.bf16 %v733_v22, %v731_v32  ;;  %v702_v0 = vpop.f32.mrf.mxu0  ;;  %v735_v41 = vadd.f32 %v734_v56, %v1756_v59 }
 0x25e   : > { %858 = vst [vmem:[%s1764_s24 + $0x18] sm:$0xff] %v1051_v33  ;;  %v703_v39 = vadd.f32 %v702_v0, %v1758_v36  ;;  %v736_v40 = vpop.f32.mrf.mxu1 }
 0x25f   : > { %865 = vst [vmem:[%s1764_s24 + $0x50] sm:$0xff] %v1058_v34  ;;  %v737_v42 = vadd.f32 %v736_v40, %v1758_v36  ;;  %v704_v1 = vpop.f32.mrf.mxu0 }
 0x260   : > { %v1052_v10 = vpack.c.bf16 %v703_v39, %v701_v35  ;;  %v740_v43 = vpop.f32.mrf.mxu1  ;;  %v705_v47 = vadd.f32 %v704_v1, %v1756_v59 }
 0x261   : > { %v1059_v29 = vpack.c.bf16 %v737_v42, %v735_v41  ;;  %v706_v44 = vpop.f32.mrf.mxu0  ;;  %v741_v49 = vadd.f32 %v740_v43, %v1756_v59 }
 0x262   : > { %859 = vst [vmem:[%s1764_s24 + $0x20] sm:$0xff] %v1052_v10  ;;  %v707_v23 = vadd.f32 %v706_v44, %v1758_v36  ;;  %v742_v48 = vpop.f32.mrf.mxu1 }
 0x263   : > { %866 = vst [vmem:[%s1764_s24 + $0x58] sm:$0xff] %v1059_v29  ;;  %v743_v11 = vadd.f32 %v742_v48, %v1758_v36  ;;  %v710_v50 = vpop.f32.mrf.mxu0 }
 0x264   : > { %v1053_v25 = vpack.c.bf16 %v707_v23, %v705_v47  ;;  %v744_v51 = vpop.f32.mrf.mxu1  ;;  %v711_v54 = vadd.f32 %v710_v50, %v1756_v59 }
 0x265   : > { %v1060_v52 = vpack.c.bf16 %v743_v11, %v741_v49  ;;  %v712_v53 = vpop.f32.mrf.mxu0  ;;  %v745_v58 = vadd.f32 %v744_v51, %v1756_v59 }
 0x266   : > { %860 = vst [vmem:[%s1764_s24 + $0x28] sm:$0xff] %v1053_v25  ;;  %v713_v57 = vadd.f32 %v712_v53, %v1758_v36  ;;  %v746_v13 = vpop.f32.mrf.mxu1 }
 0x267   : > { %867 = vst [vmem:[%s1764_s24 + $0x60] sm:$0xff] %v1060_v52  ;;  %v747_v9 = vadd.f32 %v746_v13, %v1758_v36  ;;  %v714_v30 = vpop.f32.mrf.mxu0 }
 0x268   : > { %v1054_v60 = vpack.c.bf16 %v713_v57, %v711_v54  ;;  %v750_v28 = vpop.f32.mrf.mxu1  ;;  %v715_v62 = vadd.f32 %v714_v30, %v1756_v59 }
 0x269   : > { %v1061_v61 = vpack.c.bf16 %v747_v9, %v745_v58  ;;  %v716_v37 = vpop.f32.mrf.mxu0  ;;  %v751_v3 = vadd.f32 %v750_v28, %v1756_v59 }
 0x26a   : > { %861 = vst [vmem:[%s1764_s24 + $0x30] sm:$0xff] %v1054_v60  ;;  %v717_v63 = vadd.f32 %v716_v37, %v1758_v36  ;;  %v752_v2 = vpop.f32.mrf.mxu1 }
 0x26b   : > { %868 = vst [vmem:[%s1764_s24 + $0x68] sm:$0xff] %v1061_v61  ;;  %v753_v4 = vadd.f32 %v752_v2, %v1758_v36 }
 0x26c   : > { %v1055_v5 = vpack.c.bf16 %v717_v63, %v715_v62  ;;  %v754_v6 = vpop.f32.mrf.mxu1 }
 0x26d   : > { %v1062_v38 = vpack.c.bf16 %v753_v4, %v751_v3  ;;  %v755_v8 = vadd.f32 %v754_v6, %v1756_v59 }
 0x26e   : > { %862 = vst [vmem:[%s1764_s24 + $0x38] sm:$0xff] %v1055_v5  ;;  %v756_v7 = vpop.f32.mrf.mxu1 }
 0x26f   : > { %869 = vst [vmem:[%s1764_s24 + $0x70] sm:$0xff] %v1062_v38  ;;  %v757_v16 = vadd.f32 %v756_v7, %v1758_v36 }
 0x271   : > { %v1063_v45 = vpack.c.bf16 %v757_v16, %v755_v8 }
 0x273   : > { %870 = vst [vmem:[%s1764_s24 + $0x78] sm:$0xff] %v1063_v45 }
 0x274   : > { %1318 = shalt.err (!%p1315_p2)
}
 0x275   : > { %s1319_s9 = scalar_lea.hbm %s1816_s11, 2048  ;;  %s1323_s23 = scalar_lea.hbm %s1872_s5, 4096 }
 0x276   : > { %p1320_p6 = scmp.ne.s32.totalorder %s1816_s11, %s1319_s9  ;;  %p1324_p0 = scmp.lt.s32.totalorder %s1816_s11, %s1872_s5 }
 0x277   : > { %p1325_p10 = scmp.lt.s32.totalorder %s1323_s23, %s1319_s9 }
 0x278   : > { %p1321_p11 = pnand %p1320_p6, %p1899_p7 }
 0x279   : > { %p1326_p5 = por %p1325_p10, %p1324_p0 }
 0x27a   : > { %p1322_p1 = pneg %p1321_p11 }
 0x27c   : > { %p1327_p3 = pnand %p1326_p5, %p1322_p1 }
 0x27e   : > { %1330 = shalt.err (!%p1327_p3)
}
 0x27f   : > { %s1398_s6 = smov 128   ;;  %s1399_s24 = smov 8  }
 0x280   : > { %1091 = dma.vmem_to_hbm [thread:$0]  (%p1899_p7), %s1818_s16, 2048, %s1816_s11, %s872_s21, %s1398_s6, %s1398_s6, %s1399_s24  }
 0x281 PF: > { %s1900_s25 = sld [smem:[#allocation13_spill]]  ;;  %s903_s27 = sand.u32 1, %s1369_s18  }
 0x282   : > { %s1901_s12 = sld [smem:[#allocation12_spill]]  ;;  %s904_s7 = scalar_lea.sflag [#allocation4], %s903_s27 }
 0x287   : > { %p1902_p8 = scmp.ne.s32.totalorder %s1900_s25, 0 }
 0x288   : > { %p1903_p9 = scmp.ge.s32.totalorder %s1901_s12, 2 }
 0x28a   : > { %p1105_p12 = pnand %p1903_p9, %p1902_p8 }
 0x28c   : > { %p1106_p13 = pneg %p1105_p12 }
 0x28e   : > { %1364 = dma.done.wait (%p1106_p13), %s904_s7, 2048  }
 0x28f   : > { %1366 = vsyncadd (%p1106_p13), %s904_s7, 4294965248  ;;  %s22_s23 = sadd.s32 1, %s1901_s12   ;;  %s1904_s18 = smov %s1373_s19 }
 0x290   : > { %p19_p4 = scmp.ge.s32.totalorder %s22_s23, 4   ;;  %s1905_s19 = smov %s1377_s20 }
 0x291   : > { %s1906_s20 = smov %s1557_s30  ;;  %s1907_s21 = smov %s1385_s22 }
 0x292   : > { %s1908_s22 = smov %s1910_s10  ;;  %21 = sbr.rel (!%p19_p4) target bundleno = 9 (0x9), region = 93 }
 0x297   :  { %909 = vsyncpa [#allocation3], 1 }
 0x298   :  { %911 = vsyncpa [#allocation3 + $0x1], 1 }
 0x299   :  { %912 = vsyncpa [#allocation6], 1 }
 0x29a   :  { %913 = vsyncpa [#allocation4], 1 }
 0x29b   :  { %915 = vsyncpa [#allocation4 + $0x1], 1 }

</bundles_post_ra>
